<compile_context>
chip_gen: v5e
topology: v5e:2x2
jax: 0.10.0
libtpu: 0.0.40
codegen_flags: <defaults>
</compile_context>

<pallas_src>
import math

import jax
import jax.numpy as jnp
from jax import lax
from jax.experimental import pallas as pl

# ----------------------------- hyperparameters -----------------------------
EMBED_DIM = 128          # embedding_dim (H)
N_HEADS = 8              # n_heads
HEAD_DIM = EMBED_DIM // N_HEADS
TANH_CLIP = 10.0         # tanh_clipping

B = 2                    # batch
N = 16                   # number of nodes
G = 8                    # group (rollout) size
N_PAD = 128              # lane-dense node axis inside the kernel


# ------------------------------ softmax helpers -----------------------------
def _softmax_fast(x):
    # in-kernel softmax: approximate reciprocal uses the EUP slot (free-ish)
    m = jnp.max(x, axis=-1, keepdims=True)
    e = jnp.exp(x - m)
    return e * pl.reciprocal(jnp.sum(e, axis=-1, keepdims=True), approx=True)


def _softmax_ref(x):
    m = jnp.max(x, axis=-1, keepdims=True)
    e = jnp.exp(x - m)
    return e / jnp.sum(e, axis=-1, keepdims=True)


# --------------------------------- kernel ----------------------------------
def path_decoder_kernel(last_emb_ref, qfix_ref, kexp_ref, vexp_ref, logitk_ref,
                        mask_ref, wq_last_t_ref, wcomb_t_ref, bcomb_ref,
                        out_ref):
    # Shapes (whole arrays resident in VMEM, single invocation):
    #   last_emb_ref [B*G, H]  f32   gathered last-node embeddings (flattened)
    #   qfix_ref     [B*G, H]  f32   q_graph+q_source+q_target+q_first (pre-head)
    #   kexp_ref     [B, nh, N_PAD, H] bf16  head-expanded K (1/sqrt(d) folded in)
    #   vexp_ref     [B, nh, N_PAD, H] bf16  head-expanded V
    #   logitk_ref   [B, N_PAD, H]     bf16  padded node embeddings (logit_k)
    #   mask_ref     [B, G, N_PAD]     f32   group -inf mask (pad cols = -inf)
    #   wq_last_t_ref [H, H]           bf16  Wq_last^T
    #   wcomb_t_ref   [H, H]           bf16  W_combine^T * 1/sqrt(H)
    #   bcomb_ref     [1, H]           f32   b_combine * 1/sqrt(H)
    #   out_ref      [B, G, N_PAD]     f32   probabilities (lane-dense store)
    f32 = jnp.float32
    bf16 = jnp.bfloat16

    # q_last over the flattened batch*group rows (one big MXU matmul)
    q_last = jnp.dot(last_emb_ref[...].astype(bf16), wq_last_t_ref[...],
                     preferred_element_type=f32)                  # [B*G, H]
    glimpse_q = (qfix_ref[...] + q_last).astype(bf16)             # [B*G, H]

    for b in range(B):                       # B=2, unrolled at trace time
        mb = mask_ref[b]                                          # [G, N_PAD]
        qb = glimpse_q[b * G:(b + 1) * G, :]                      # [G, H] bf16
        qh = jnp.broadcast_to(qb[None], (N_HEADS, G, EMBED_DIM))  # [nh, G, H]

        # per-head scores: contraction over the full H picks out head h's 16
        # columns because K is zero-expanded.  [nh,G,H] x [nh,Npad,H] -> [nh,G,Npad]
        s = lax.dot_general(qh, kexp_ref[b],
                            (((2,), (2,)), ((0,), (0,))),
                            preferred_element_type=f32)
        s = s + mb[None, :, :]
        p = _softmax_fast(s)                                      # [nh,G,Npad] f32

        # context already lands in the right output columns via V_exp; summing
        # over heads yields the concatenated MHA output.  -> [G, H]
        ctx = lax.dot_general(p.astype(bf16), vexp_ref[b],
                              (((2,), (1,)), ((0,), (0,))),
                              preferred_element_type=f32)         # [nh, G, H]
        attn = jnp.sum(ctx, axis=0)                               # [G, H] f32

        # multi_head_combine (1/sqrt(H) pre-folded into weight + bias)
        final_q = jnp.dot(attn.astype(bf16), wcomb_t_ref[...],
                          preferred_element_type=f32) + bcomb_ref[...]  # [G, H]

        # score = final_q @ logit_k^T — contract last dims, no transposed temp
        logits = lax.dot_general(final_q.astype(bf16), logitk_ref[b],
                                 (((1,), (1,)), ((), ())),
                                 preferred_element_type=f32)      # [G, N_PAD]
        masked = TANH_CLIP * jnp.tanh(logits) + mb
        out_ref[b] = _softmax_fast(masked)                        # lane-dense store


def path_decoder_forward_pallas(last_emb_flat, cache, prep):
    probs_pad = pl.pallas_call(
        path_decoder_kernel,
        out_shape=jax.ShapeDtypeStruct((B, G, N_PAD), jnp.float32),
    )(last_emb_flat, cache["q_fixed"], cache["k_exp"], cache["v_exp"],
      cache["logit_k"], cache["mask"],
      prep["wq_last_t"], prep["wcomb_t"], prep["b_comb"])
    return probs_pad[:, :, :N]


# ------------------------------ JAX glue ------------------------------------
def init_params(key):
    # deterministic synthetic weights; torch Linear default: U(-1/sqrt(in), 1/sqrt(in))
    ks = jax.random.split(key, 9)
    bound = 1.0 / math.sqrt(EMBED_DIM)
    lin = lambda k: jax.random.uniform(k, (EMBED_DIM, EMBED_DIM), jnp.float32,
                                       -bound, bound)
    return dict(
        Wq_graph=lin(ks[0]), Wq_source=lin(ks[1]), Wq_target=lin(ks[2]),
        Wq_first=lin(ks[3]), Wq_last=lin(ks[4]), Wk=lin(ks[5]), Wv=lin(ks[6]),
        W_comb=lin(ks[7]),
        b_comb=jax.random.uniform(ks[8], (EMBED_DIM,), jnp.float32, -bound, bound),
    )


def prepare_params(params):
    # one-time prep: pre-transpose, fold static scales, pre-cast MXU weights to bf16
    inv_sqrt_h = 1.0 / math.sqrt(EMBED_DIM)
    return dict(
        wq_last_t=params["Wq_last"].T.astype(jnp.bfloat16),
        wcomb_t=(params["W_comb"].T * inv_sqrt_h).astype(jnp.bfloat16),
        b_comb=(params["b_comb"] * inv_sqrt_h).astype(jnp.float32)[None, :],
    )


def gather_nodes(embeddings, node_idx):
    # embeddings [B,N,H], node_idx [B,G] -> [B,G,H]  (== torch gather on dim 1)
    return jnp.take_along_axis(embeddings, node_idx[:, :, None], axis=1)


def reset_q_fixed(embeddings, source_node, target_node, first_node, params):
    graph_emb = jnp.mean(embeddings, axis=1, keepdims=True)                  # [B,1,H]
    q_graph = graph_emb @ params["Wq_graph"].T
    q_source = gather_nodes(embeddings, source_node) @ params["Wq_source"].T
    q_target = gather_nodes(embeddings, target_node) @ params["Wq_target"].T
    q_first = gather_nodes(embeddings, first_node) @ params["Wq_first"].T
    return q_graph + q_source + q_target + q_first                           # [B,G,H]


def reset_decoder(embeddings, group_ninf_mask, source_node, target_node,
                  first_node, params):
    """PathDecoder.reset(): everything invariant across decode steps."""
    bf16 = jnp.bfloat16
    q_fixed = reset_q_fixed(embeddings, source_node, target_node, first_node,
                            params).reshape(B * G, EMBED_DIM)               # [BG,H] f32

    inv_sqrt_d = 1.0 / math.sqrt(HEAD_DIM)
    glimpse_k = (embeddings @ params["Wk"].T) * inv_sqrt_d   # scale folded into K
    glimpse_v = embeddings @ params["Wv"].T
    pad = N_PAD - N
    glimpse_k = jnp.pad(glimpse_k, ((0, 0), (0, pad), (0, 0)))
    glimpse_v = jnp.pad(glimpse_v, ((0, 0), (0, pad), (0, 0)))
    logit_k = jnp.pad(embeddings, ((0, 0), (0, pad), (0, 0))).astype(bf16)

    # head expansion: head h of K/V placed in columns [h*d,(h+1)*d), 0 elsewhere,
    # so a full-H contraction against un-split q reproduces per-head attention.
    head_of_col = jnp.arange(EMBED_DIM) // HEAD_DIM
    head_sel = (head_of_col[None, :] == jnp.arange(N_HEADS)[:, None]
                ).astype(jnp.float32)                                        # [nh,H]
    k_exp = (glimpse_k[:, None, :, :] * head_sel[None, :, None, :]).astype(bf16)
    v_exp = (glimpse_v[:, None, :, :] * head_sel[None, :, None, :]).astype(bf16)

    mask = jnp.pad(group_ninf_mask, ((0, 0), (0, 0), (0, pad)),
                   constant_values=-jnp.inf)                                 # [B,G,Npad]
    return dict(q_fixed=q_fixed, k_exp=k_exp, v_exp=v_exp,
                logit_k=logit_k, mask=mask)


# ------------------------------- references ---------------------------------
def reference_matched(last_emb_flat, cache, prep):
    """Plain-JAX mirror of the kernel math using the same prepared bf16 inputs
    and f32 accumulation — tight check of the kernel algorithm itself."""
    f32, bf16 = jnp.float32, jnp.bfloat16
    q_last = jnp.dot(last_emb_flat.astype(bf16), prep["wq_last_t"],
                     preferred_element_type=f32)
    gq = (cache["q_fixed"] + q_last).astype(bf16).reshape(B, G, EMBED_DIM)
    s = jnp.einsum("bgh,bknh->bkgn", gq, cache["k_exp"],
                   preferred_element_type=f32)
    s = s + cache["mask"][:, None]
    p = _softmax_ref(s)
    ctx = jnp.einsum("bkgn,bknh->bkgh", p.astype(bf16), cache["v_exp"],
                     preferred_element_type=f32)
    attn = jnp.sum(ctx, axis=1)                                              # [B,G,H]
    fq = jnp.einsum("bgh,hm->bgm", attn.astype(bf16), prep["wcomb_t"],
                    preferred_element_type=f32) + prep["b_comb"]
    logits = jnp.einsum("bgm,bnm->bgn", fq.astype(bf16), cache["logit_k"],
                        preferred_element_type=f32)
    masked = TANH_CLIP * jnp.tanh(logits) + cache["mask"]
    return _softmax_ref(masked)[:, :, :N]


def reference_forward_f32(last_node, embeddings, mask, source_node, target_node,
                          first_node, params):
    """Torch-faithful full-f32 reference (explicit head split)."""
    def make_heads(x):  # [B,T,H] -> [B,nh,T,d]
        b, t, _ = x.shape
        return x.reshape(b, t, N_HEADS, HEAD_DIM).transpose(0, 2, 1, 3)

    graph_emb = jnp.mean(embeddings, axis=1, keepdims=True)
    q_graph = make_heads(graph_emb @ params["Wq_graph"].T)
    q_source = make_heads(gather_nodes(embeddings, source_node) @ params["Wq_source"].T)
    q_target = make_heads(gather_nodes(embeddings, target_node) @ params["Wq_target"].T)
    q_first = make_heads(gather_nodes(embeddings, first_node) @ params["Wq_first"].T)
    q_last = make_heads(gather_nodes(embeddings, last_node) @ params["Wq_last"].T)
    glimpse_q = q_graph + q_source + q_target + q_first + q_last
    k = make_heads(embeddings @ params["Wk"].T)
    v = make_heads(embeddings @ params["Wv"].T)
    score = jnp.einsum("bhgd,bhnd->bhgn", glimpse_q, k) / math.sqrt(HEAD_DIM)
    score = score + mask[:, None, :, :]
    attn = jnp.einsum("bhgn,bhnd->bhgd", _softmax_ref(score), v)
    attn = attn.transpose(0, 2, 1, 3).reshape(B, G, EMBED_DIM)
    final_q = attn @ params["W_comb"].T + params["b_comb"]
    logits = jnp.einsum("bgh,bnh->bgn", final_q, embeddings) / math.sqrt(EMBED_DIM)
    masked = TANH_CLIP * jnp.tanh(logits) + mask
    return _softmax_ref(masked)


# ----------------------------------- main ------------------------------------
if __name__ == "__main__":
    key = jax.random.PRNGKey(0)
    k_par, k_emb, k_msk, k_src, k_tgt, k_fst, k_lst = jax.random.split(key, 7)

    params = init_params(k_par)
    embeddings = jax.random.normal(k_emb, (B, N, EMBED_DIM), jnp.float32)

    # group_ninf_mask: -inf for masked nodes, 0 otherwise (node 0 always open)
    masked_bool = jax.random.bernoulli(k_msk, 0.3, (B, G, N))
    masked_bool = masked_bool.at[:, :, 0].set(False)
    group_ninf_mask = jnp.where(masked_bool, -jnp.inf, 0.0).astype(jnp.float32)

    source_node = jax.random.randint(k_src, (B, G), 0, N)
    target_node = jax.random.randint(k_tgt, (B, G), 0, N)
    first_node = jax.random.randint(k_fst, (B, G), 0, N)
    last_node = jax.random.randint(k_lst, (B, G), 0, N)

    # reset() equivalent: step-invariant precompute (K/V/logit_k hoisted here)
    prep = prepare_params(params)
    cache = reset_decoder(embeddings, group_ninf_mask, source_node, target_node,
                          first_node, params)

    # forward(): gather is glue; all per-step math runs inside the Pallas kernel
    last_emb = gather_nodes(embeddings, last_node).reshape(B * G, EMBED_DIM)
    probs = path_decoder_forward_pallas(last_emb, cache, prep)
    probs = jax.block_until_ready(probs)

    ref_match = reference_matched(last_emb, cache, prep)
    ref_f32 = reference_forward_f32(last_node, embeddings, group_ninf_mask,
                                    source_node, target_node, first_node, params)

    assert bool(jnp.all(probs == probs)), "Probs should not contain any nans!"
    assert bool(jnp.allclose(jnp.sum(probs, axis=-1), 1.0, atol=5e-3))
    # tight check of the kernel algorithm vs a matched bf16/f32-accum reference
    assert bool(jnp.allclose(probs, ref_match, rtol=1e-2, atol=1e-2)), \
        "mismatch vs matched-precision reference"
    # bf16-quantization sanity bound vs the torch-faithful full-f32 reference
    assert bool(jnp.allclose(probs, ref_f32, rtol=5e-2, atol=7e-2)), \
        "mismatch vs f32 reference beyond bf16 tolerance"
    print("KERNEL_OK")
</pallas_src>

<mosaic_0001>
module attributes {stable_mosaic.version = 11 : i64} {
  func.func @path_decoder_kernel(%arg0: memref<16x128xf32, #tpu.memory_space<vmem>>, %arg1: memref<16x128xf32, #tpu.memory_space<vmem>>, %arg2: memref<2x8x128x128xbf16, #tpu.memory_space<vmem>>, %arg3: memref<2x8x128x128xbf16, #tpu.memory_space<vmem>>, %arg4: memref<2x128x128xbf16, #tpu.memory_space<vmem>>, %arg5: memref<2x8x128xf32, #tpu.memory_space<vmem>>, %arg6: memref<128x128xbf16, #tpu.memory_space<vmem>>, %arg7: memref<128x128xbf16, #tpu.memory_space<vmem>>, %arg8: memref<1x128xf32, #tpu.memory_space<vmem>>, %arg9: memref<2x8x128xf32, #tpu.memory_space<vmem>>) attributes {dimension_semantics = [], scalar_prefetch = 0 : i64, scratch_operands = 0 : i64, tpu.core_type = #tpu.core_type<tc>} {
    %c0 = arith.constant 0 : index
    %c0_0 = arith.constant 0 : index
    %0 = vector.load %arg0[%c0, %c0_0] : memref<16x128xf32, #tpu.memory_space<vmem>>, vector<16x128xf32>
    %1 = arith.truncf %0 : vector<16x128xf32> to vector<16x128xbf16>
    %c0_1 = arith.constant 0 : index
    %c0_2 = arith.constant 0 : index
    %2 = vector.load %arg6[%c0_1, %c0_2] : memref<128x128xbf16, #tpu.memory_space<vmem>>, vector<128x128xbf16>
    %cst = arith.constant dense<0.000000e+00> : vector<16x128xf32>
    %3 = tpu.matmul %1, %2, %cst {dimension_numbers = #tpu.dot_dimension_numbers<[1], [0], [0], [1], [0, 0, 1, 1], [], []>} : vector<16x128xbf16>, vector<128x128xbf16>, vector<16x128xf32> -> vector<16x128xf32>
    %c0_3 = arith.constant 0 : index
    %c0_4 = arith.constant 0 : index
    %4 = vector.load %arg1[%c0_3, %c0_4] : memref<16x128xf32, #tpu.memory_space<vmem>>, vector<16x128xf32>
    %5 = arith.addf %4, %3 : vector<16x128xf32>
    %6 = arith.truncf %5 : vector<16x128xf32> to vector<16x128xbf16>
    %c0_5 = arith.constant 0 : index
    %c0_6 = arith.constant 0 : index
    %c0_7 = arith.constant 0 : index
    %7 = vector.load %arg5[%c0_5, %c0_6, %c0_7] : memref<2x8x128xf32, #tpu.memory_space<vmem>>, vector<1x8x128xf32>
    %8 = vector.shape_cast %7 : vector<1x8x128xf32> to vector<8x128xf32>
    %9 = vector.extract_strided_slice %6 {offsets = [0, 0], sizes = [8, 128], strides = [1, 1]} : vector<16x128xbf16> to vector<8x128xbf16>
    %10 = vector.shape_cast %9 : vector<8x128xbf16> to vector<1x8x128xbf16>
    %11 = vector.shape_cast %10 : vector<1x8x128xbf16> to vector<1x8x128xbf16>
    %12 = vector.broadcast %11 : vector<1x8x128xbf16> to vector<8x8x128xbf16>
    %c0_8 = arith.constant 0 : index
    %c0_9 = arith.constant 0 : index
    %c0_10 = arith.constant 0 : index
    %c0_11 = arith.constant 0 : index
    %13 = vector.load %arg2[%c0_8, %c0_9, %c0_10, %c0_11] : memref<2x8x128x128xbf16, #tpu.memory_space<vmem>>, vector<1x8x128x128xbf16>
    %14 = vector.shape_cast %13 : vector<1x8x128x128xbf16> to vector<8x128x128xbf16>
    %cst_12 = arith.constant dense<0.000000e+00> : vector<8x8x128xf32>
    %15 = tpu.matmul %12, %14, %cst_12 {dimension_numbers = #tpu.dot_dimension_numbers<[2], [2], [1], [1], [0, 0, 0, 1, 1, 1], [0], [0]>} : vector<8x8x128xbf16>, vector<8x128x128xbf16>, vector<8x8x128xf32> -> vector<8x8x128xf32>
    %16 = vector.shape_cast %8 : vector<8x128xf32> to vector<1x8x128xf32>
    %17 = vector.broadcast %16 : vector<1x8x128xf32> to vector<8x8x128xf32>
    %18 = arith.addf %15, %17 : vector<8x8x128xf32>
    %cst_13 = arith.constant dense<0xFF800000> : vector<8x8xf32>
    %19 = vector.multi_reduction <maximumf>, %18, %cst_13 [2] : vector<8x8x128xf32> to vector<8x8xf32>
    %20 = vector.shape_cast %19 : vector<8x8xf32> to vector<8x8x1xf32>
    %21 = vector.broadcast %20 : vector<8x8x1xf32> to vector<8x8x128xf32>
    %22 = arith.subf %18, %21 : vector<8x8x128xf32>
    %23 = math.exp %22 : vector<8x8x128xf32>
    %cst_14 = arith.constant dense<0.000000e+00> : vector<8x8xf32>
    %24 = vector.multi_reduction <add>, %23, %cst_14 [2] : vector<8x8x128xf32> to vector<8x8xf32>
    %25 = vector.shape_cast %24 : vector<8x8xf32> to vector<8x8x1xf32>
    %26 = tpu.reciprocal %25 {approx = true} : vector<8x8x1xf32> -> vector<8x8x1xf32>
    %27 = vector.broadcast %26 : vector<8x8x1xf32> to vector<8x8x128xf32>
    %28 = arith.mulf %23, %27 : vector<8x8x128xf32>
    %29 = arith.truncf %28 : vector<8x8x128xf32> to vector<8x8x128xbf16>
    %c0_15 = arith.constant 0 : index
    %c0_16 = arith.constant 0 : index
    %c0_17 = arith.constant 0 : index
    %c0_18 = arith.constant 0 : index
    %30 = vector.load %arg3[%c0_15, %c0_16, %c0_17, %c0_18] : memref<2x8x128x128xbf16, #tpu.memory_space<vmem>>, vector<1x8x128x128xbf16>
    %31 = vector.shape_cast %30 : vector<1x8x128x128xbf16> to vector<8x128x128xbf16>
    %cst_19 = arith.constant dense<0.000000e+00> : vector<8x8x128xf32>
    %32 = tpu.matmul %29, %31, %cst_19 {dimension_numbers = #tpu.dot_dimension_numbers<[2], [1], [1], [2], [0, 0, 0, 1, 1, 2], [0], [0]>} : vector<8x8x128xbf16>, vector<8x128x128xbf16>, vector<8x8x128xf32> -> vector<8x8x128xf32>
    %cst_20 = arith.constant dense<0.000000e+00> : vector<8x128xf32>
    %33 = vector.multi_reduction <add>, %32, %cst_20 [0] : vector<8x8x128xf32> to vector<8x128xf32>
    %34 = arith.truncf %33 : vector<8x128xf32> to vector<8x128xbf16>
    %c0_21 = arith.constant 0 : index
    %c0_22 = arith.constant 0 : index
    %35 = vector.load %arg7[%c0_21, %c0_22] : memref<128x128xbf16, #tpu.memory_space<vmem>>, vector<128x128xbf16>
    %cst_23 = arith.constant dense<0.000000e+00> : vector<8x128xf32>
    %36 = tpu.matmul %34, %35, %cst_23 {dimension_numbers = #tpu.dot_dimension_numbers<[1], [0], [0], [1], [0, 0, 1, 1], [], []>} : vector<8x128xbf16>, vector<128x128xbf16>, vector<8x128xf32> -> vector<8x128xf32>
    %c0_24 = arith.constant 0 : index
    %c0_25 = arith.constant 0 : index
    %37 = vector.load %arg8[%c0_24, %c0_25] : memref<1x128xf32, #tpu.memory_space<vmem>>, vector<1x128xf32>
    %38 = vector.broadcast %37 : vector<1x128xf32> to vector<8x128xf32>
    %39 = arith.addf %36, %38 : vector<8x128xf32>
    %40 = arith.truncf %39 : vector<8x128xf32> to vector<8x128xbf16>
    %c0_26 = arith.constant 0 : index
    %c0_27 = arith.constant 0 : index
    %c0_28 = arith.constant 0 : index
    %41 = vector.load %arg4[%c0_26, %c0_27, %c0_28] : memref<2x128x128xbf16, #tpu.memory_space<vmem>>, vector<1x128x128xbf16>
    %42 = vector.shape_cast %41 : vector<1x128x128xbf16> to vector<128x128xbf16>
    %cst_29 = arith.constant dense<0.000000e+00> : vector<8x128xf32>
    %43 = tpu.matmul %40, %42, %cst_29 {dimension_numbers = #tpu.dot_dimension_numbers<[1], [1], [0], [0], [0, 0, 1, 0], [], []>} : vector<8x128xbf16>, vector<128x128xbf16>, vector<8x128xf32> -> vector<8x128xf32>
    %44 = math.tanh %43 : vector<8x128xf32>
    %cst_30 = arith.constant 1.000000e+01 : f32
    %45 = vector.broadcast %cst_30 : f32 to vector<8x128xf32>
    %46 = arith.mulf %45, %44 : vector<8x128xf32>
    %47 = arith.addf %46, %8 : vector<8x128xf32>
    %cst_31 = arith.constant dense<0xFF800000> : vector<8xf32>
    %48 = vector.multi_reduction <maximumf>, %47, %cst_31 [1] : vector<8x128xf32> to vector<8xf32>
    %49 = vector.shape_cast %48 : vector<8xf32> to vector<8x1xf32>
    %50 = vector.broadcast %49 : vector<8x1xf32> to vector<8x128xf32>
    %51 = arith.subf %47, %50 : vector<8x128xf32>
    %52 = math.exp %51 : vector<8x128xf32>
    %cst_32 = arith.constant dense<0.000000e+00> : vector<8xf32>
    %53 = vector.multi_reduction <add>, %52, %cst_32 [1] : vector<8x128xf32> to vector<8xf32>
    %54 = vector.shape_cast %53 : vector<8xf32> to vector<8x1xf32>
    %55 = tpu.reciprocal %54 {approx = true} : vector<8x1xf32> -> vector<8x1xf32>
    %56 = vector.broadcast %55 : vector<8x1xf32> to vector<8x128xf32>
    %57 = arith.mulf %52, %56 : vector<8x128xf32>
    %c0_33 = arith.constant 0 : index
    %c0_34 = arith.constant 0 : index
    %c0_35 = arith.constant 0 : index
    %58 = vector.load %arg9[%c0_33, %c0_34, %c0_35] : memref<2x8x128xf32, #tpu.memory_space<vmem>>, vector<1x8x128xf32>
    %59 = vector.shape_cast %58 : vector<1x8x128xf32> to vector<8x128xf32>
    %60 = vector.shape_cast %57 : vector<8x128xf32> to vector<1x8x128xf32>
    tpu.vector_store %arg9[%c0_33, %c0_34, %c0_35], %60 {strides = array<i32>} : memref<2x8x128xf32, #tpu.memory_space<vmem>>, vector<1x8x128xf32>,
    %c1 = arith.constant 1 : index
    %c0_36 = arith.constant 0 : index
    %c0_37 = arith.constant 0 : index
    %61 = vector.load %arg5[%c1, %c0_36, %c0_37] : memref<2x8x128xf32, #tpu.memory_space<vmem>>, vector<1x8x128xf32>
    %62 = vector.shape_cast %61 : vector<1x8x128xf32> to vector<8x128xf32>
    %63 = vector.extract_strided_slice %6 {offsets = [8, 0], sizes = [8, 128], strides = [1, 1]} : vector<16x128xbf16> to vector<8x128xbf16>
    %64 = vector.shape_cast %63 : vector<8x128xbf16> to vector<1x8x128xbf16>
    %65 = vector.shape_cast %64 : vector<1x8x128xbf16> to vector<1x8x128xbf16>
    %66 = vector.broadcast %65 : vector<1x8x128xbf16> to vector<8x8x128xbf16>
    %c1_38 = arith.constant 1 : index
    %c0_39 = arith.constant 0 : index
    %c0_40 = arith.constant 0 : index
    %c0_41 = arith.constant 0 : index
    %67 = vector.load %arg2[%c1_38, %c0_39, %c0_40, %c0_41] : memref<2x8x128x128xbf16, #tpu.memory_space<vmem>>, vector<1x8x128x128xbf16>
    %68 = vector.shape_cast %67 : vector<1x8x128x128xbf16> to vector<8x128x128xbf16>
    %cst_42 = arith.constant dense<0.000000e+00> : vector<8x8x128xf32>
    %69 = tpu.matmul %66, %68, %cst_42 {dimension_numbers = #tpu.dot_dimension_numbers<[2], [2], [1], [1], [0, 0, 0, 1, 1, 1], [0], [0]>} : vector<8x8x128xbf16>, vector<8x128x128xbf16>, vector<8x8x128xf32> -> vector<8x8x128xf32>
    %70 = vector.shape_cast %62 : vector<8x128xf32> to vector<1x8x128xf32>
    %71 = vector.broadcast %70 : vector<1x8x128xf32> to vector<8x8x128xf32>
    %72 = arith.addf %69, %71 : vector<8x8x128xf32>
    %cst_43 = arith.constant dense<0xFF800000> : vector<8x8xf32>
    %73 = vector.multi_reduction <maximumf>, %72, %cst_43 [2] : vector<8x8x128xf32> to vector<8x8xf32>
    %74 = vector.shape_cast %73 : vector<8x8xf32> to vector<8x8x1xf32>
    %75 = vector.broadcast %74 : vector<8x8x1xf32> to vector<8x8x128xf32>
    %76 = arith.subf %72, %75 : vector<8x8x128xf32>
    %77 = math.exp %76 : vector<8x8x128xf32>
    %cst_44 = arith.constant dense<0.000000e+00> : vector<8x8xf32>
    %78 = vector.multi_reduction <add>, %77, %cst_44 [2] : vector<8x8x128xf32> to vector<8x8xf32>
    %79 = vector.shape_cast %78 : vector<8x8xf32> to vector<8x8x1xf32>
    %80 = tpu.reciprocal %79 {approx = true} : vector<8x8x1xf32> -> vector<8x8x1xf32>
    %81 = vector.broadcast %80 : vector<8x8x1xf32> to vector<8x8x128xf32>
    %82 = arith.mulf %77, %81 : vector<8x8x128xf32>
    %83 = arith.truncf %82 : vector<8x8x128xf32> to vector<8x8x128xbf16>
    %c1_45 = arith.constant 1 : index
    %c0_46 = arith.constant 0 : index
    %c0_47 = arith.constant 0 : index
    %c0_48 = arith.constant 0 : index
    %84 = vector.load %arg3[%c1_45, %c0_46, %c0_47, %c0_48] : memref<2x8x128x128xbf16, #tpu.memory_space<vmem>>, vector<1x8x128x128xbf16>
    %85 = vector.shape_cast %84 : vector<1x8x128x128xbf16> to vector<8x128x128xbf16>
    %cst_49 = arith.constant dense<0.000000e+00> : vector<8x8x128xf32>
    %86 = tpu.matmul %83, %85, %cst_49 {dimension_numbers = #tpu.dot_dimension_numbers<[2], [1], [1], [2], [0, 0, 0, 1, 1, 2], [0], [0]>} : vector<8x8x128xbf16>, vector<8x128x128xbf16>, vector<8x8x128xf32> -> vector<8x8x128xf32>
    %cst_50 = arith.constant dense<0.000000e+00> : vector<8x128xf32>
    %87 = vector.multi_reduction <add>, %86, %cst_50 [0] : vector<8x8x128xf32> to vector<8x128xf32>
    %88 = arith.truncf %87 : vector<8x128xf32> to vector<8x128xbf16>
    %c0_51 = arith.constant 0 : index
    %c0_52 = arith.constant 0 : index
    %89 = vector.load %arg7[%c0_51, %c0_52] : memref<128x128xbf16, #tpu.memory_space<vmem>>, vector<128x128xbf16>
    %cst_53 = arith.constant dense<0.000000e+00> : vector<8x128xf32>
    %90 = tpu.matmul %88, %89, %cst_53 {dimension_numbers = #tpu.dot_dimension_numbers<[1], [0], [0], [1], [0, 0, 1, 1], [], []>} : vector<8x128xbf16>, vector<128x128xbf16>, vector<8x128xf32> -> vector<8x128xf32>
    %c0_54 = arith.constant 0 : index
    %c0_55 = arith.constant 0 : index
    %91 = vector.load %arg8[%c0_54, %c0_55] : memref<1x128xf32, #tpu.memory_space<vmem>>, vector<1x128xf32>
    %92 = vector.broadcast %91 : vector<1x128xf32> to vector<8x128xf32>
    %93 = arith.addf %90, %92 : vector<8x128xf32>
    %94 = arith.truncf %93 : vector<8x128xf32> to vector<8x128xbf16>
    %c1_56 = arith.constant 1 : index
    %c0_57 = arith.constant 0 : index
    %c0_58 = arith.constant 0 : index
    %95 = vector.load %arg4[%c1_56, %c0_57, %c0_58] : memref<2x128x128xbf16, #tpu.memory_space<vmem>>, vector<1x128x128xbf16>
    %96 = vector.shape_cast %95 : vector<1x128x128xbf16> to vector<128x128xbf16>
    %cst_59 = arith.constant dense<0.000000e+00> : vector<8x128xf32>
    %97 = tpu.matmul %94, %96, %cst_59 {dimension_numbers = #tpu.dot_dimension_numbers<[1], [1], [0], [0], [0, 0, 1, 0], [], []>} : vector<8x128xbf16>, vector<128x128xbf16>, vector<8x128xf32> -> vector<8x128xf32>
    %98 = math.tanh %97 : vector<8x128xf32>
    %cst_60 = arith.constant 1.000000e+01 : f32
    %99 = vector.broadcast %cst_60 : f32 to vector<8x128xf32>
    %100 = arith.mulf %99, %98 : vector<8x128xf32>
    %101 = arith.addf %100, %62 : vector<8x128xf32>
    %cst_61 = arith.constant dense<0xFF800000> : vector<8xf32>
    %102 = vector.multi_reduction <maximumf>, %101, %cst_61 [1] : vector<8x128xf32> to vector<8xf32>
    %103 = vector.shape_cast %102 : vector<8xf32> to vector<8x1xf32>
    %104 = vector.broadcast %103 : vector<8x1xf32> to vector<8x128xf32>
    %105 = arith.subf %101, %104 : vector<8x128xf32>
    %106 = math.exp %105 : vector<8x128xf32>
    %cst_62 = arith.constant dense<0.000000e+00> : vector<8xf32>
    %107 = vector.multi_reduction <add>, %106, %cst_62 [1] : vector<8x128xf32> to vector<8xf32>
    %108 = vector.shape_cast %107 : vector<8xf32> to vector<8x1xf32>
    %109 = tpu.reciprocal %108 {approx = true} : vector<8x1xf32> -> vector<8x1xf32>
    %110 = vector.broadcast %109 : vector<8x1xf32> to vector<8x128xf32>
    %111 = arith.mulf %106, %110 : vector<8x128xf32>
    %c1_63 = arith.constant 1 : index
    %c0_64 = arith.constant 0 : index
    %c0_65 = arith.constant 0 : index
    %112 = vector.load %arg9[%c1_63, %c0_64, %c0_65] : memref<2x8x128xf32, #tpu.memory_space<vmem>>, vector<1x8x128xf32>
    %113 = vector.shape_cast %112 : vector<1x8x128xf32> to vector<8x128xf32>
    %114 = vector.shape_cast %111 : vector<8x128xf32> to vector<1x8x128xf32>
    tpu.vector_store %arg9[%c1_63, %c0_64, %c0_65], %114 {strides = array<i32>} : memref<2x8x128xf32, #tpu.memory_space<vmem>>, vector<1x8x128xf32>,
    return
  }
}

</mosaic_0001>

<bundles_post_ra>
// kernel: tpu_custom_call.1
= control target key start
LH: loop header
LB: loop body
LE: loop exit
PB: predicated region body
PF: predicated region fallthrough
CT: control target
= control target key end

     0   :  { %14 = vsyncpa [#allocation3], 0  ;;  %s5309_s0 = inlined_call_operand.hbm [shape: f32[16,128], index: 0, kind: input, shape index: {}]   ;;  %s5310_s1 = inlined_call_operand.hbm [shape: f32[16,128], index: 1, kind: input, shape index: {}]   ;;  %s5311_s2 = inlined_call_operand.hbm [shape: bf16[2,8,128,128], index: 2, kind: input, shape index: {}]   ;;  %s5312_s3 = inlined_call_operand.hbm [shape: bf16[2,8,128,128], index: 3, kind: input, shape index: {}]   ;;  %s5313_s4 = inlined_call_operand.hbm [shape: bf16[2,128,128], index: 4, kind: input, shape index: {}]   ;;  %s5314_s5 = inlined_call_operand.hbm [shape: f32[2,8,128], index: 5, kind: input, shape index: {}]   ;;  %s5315_s6 = inlined_call_operand.hbm [shape: bf16[128,128], index: 6, kind: input, shape index: {}]   ;;  %s5316_s7 = inlined_call_operand.hbm [shape: bf16[128,128], index: 7, kind: input, shape index: {}]   ;;  %s5317_s8 = inlined_call_operand.vmem [shape: f32[1,128], index: 8, kind: input, shape index: {}]   ;;  %s5318_s9 = inlined_call_operand.hbm [shape: f32[2,8,128], index: 9, kind: output, shape index: {}]  }
   0x1   :  { %15 = vsyncpa [#allocation6], 0 }
   0x2   :  { %16 = vsyncpa [#allocation9], 0 }
   0x3   :  { %17 = vsyncpa [#allocation12], 0 }
   0x4   :  { %18 = vsyncpa [#allocation15], 0 }
   0x5   :  { %19 = vsyncpa [#allocation4], 0  ;;  %s37_s11 = sshll.u32 %s5310_s1, 4  ;;  %s5059_s12 = smov [#allocation5]   ;;  %s38_s11 = int_to_ptr.hbm [resolvable:$true] %s37_s11 }
   0x6   :  { %s39_s13 = sshll.u32 %s5059_s12, 4  ;;  %s5060_s14 = smov 128   ;;  %s40_s13 = int_to_ptr.vmem [resolvable:$true] %s39_s13 }
   0x7   :  { %s5061_s15 = smov 8   ;;  %s63_s18 = sshll.u32 %s5312_s3, 4  ;;  %s64_s18 = int_to_ptr.hbm [resolvable:$true] %s63_s18 }
   0x8   :  { %45 = dma.hbm_to_vmem [thread:$0]  %s38_s11, 256, %s40_s13, [#allocation6], %s5060_s14, %s5060_s14, %s5061_s15  }
   0x9   :  { %s5062_s19 = smov [#allocation8]   ;;  %s89_s1 = sshll.u32 %s5314_s5, 4  ;;  %s90_s1 = int_to_ptr.hbm [resolvable:$true] %s89_s1 }
   0xa   :  { %s65_s20 = sshll.u32 %s5062_s19, 4  ;;  %s5063_s23 = smov 64   ;;  %s66_s20 = int_to_ptr.vmem [resolvable:$true] %s65_s20 }
   0xb   :  { %s5064_s24 = smov 4   ;;  %s24_s27 = sshll.u32 %s5309_s0, 4  ;;  %s25_s27 = int_to_ptr.hbm [resolvable:$true] %s24_s27 }
   0xc   :  { %71 = dma.hbm_to_vmem [thread:$0]  %s64_s18, 16384, %s66_s20, [#allocation9], %s5063_s23, %s5063_s23, %s5064_s24  }
   0xd   :  { %s5065_s3 = smov [#allocation11]   ;;  %s5066_s5 = smov [#allocation2]  }
   0xe   :  { %s91_s28 = sshll.u32 %s5065_s3, 4  ;;  %s26_s29 = sshll.u32 %s5066_s5, 4  ;;  %s92_s28 = int_to_ptr.vmem [resolvable:$true] %s91_s28  ;;  %s27_s29 = int_to_ptr.vmem [resolvable:$true] %s26_s29 }
   0xf   :  { %97 = dma.hbm_to_vmem [thread:$0]  %s90_s1, 256, %s92_s28, [#allocation12], %s5060_s14, %s5060_s14, %s5061_s15  }
  0x10   :  { %s50_s11 = sshll.u32 %s5311_s2, 4  ;;  %s76_s13 = sshll.u32 %s5313_s4, 4  ;;  %s51_s11 = int_to_ptr.hbm [resolvable:$true] %s50_s11  ;;  %s77_s13 = int_to_ptr.hbm [resolvable:$true] %s76_s13 }
  0x11   :  { %32 = dma.hbm_to_vmem [thread:$0]  %s25_s27, 256, %s27_s29, [#allocation3], %s5060_s14, %s5060_s14, %s5061_s15  }
  0x12   :  { %s5067_s16 = smov [#allocation7]   ;;  %s5068_s18 = smov [#allocation10]  }
  0x13   :  { %s52_s17 = sshll.u32 %s5067_s16, 4  ;;  %s78_s2 = sshll.u32 %s5068_s18, 4  ;;  %s53_s17 = int_to_ptr.vmem [resolvable:$true] %s52_s17  ;;  %s79_s2 = int_to_ptr.vmem [resolvable:$true] %s78_s2 }
  0x14   :  { %58 = dma.hbm_to_vmem [thread:$0]  %s51_s11, 16384, %s53_s17, [#allocation6], %s5063_s23, %s5063_s23, %s5064_s24  }
  0x15   :  { %s102_s21 = sshll.u32 %s5315_s6, 4  ;;  %s115_s1 = sshll.u32 %s5316_s7, 4  ;;  %s103_s21 = int_to_ptr.hbm [resolvable:$true] %s102_s21  ;;  %s116_s1 = int_to_ptr.hbm [resolvable:$true] %s115_s1 }
  0x16   :  { %84 = dma.hbm_to_vmem [thread:$0]  %s77_s13, 2048, %s79_s2, [#allocation9], %s5063_s23, %s5063_s23, %s5064_s24  }
  0x17   :  { %s5069_s25 = smov [#allocation13]   ;;  %s5070_s27 = smov [#allocation14]  }
  0x18   :  { %s104_s26 = sshll.u32 %s5069_s25, 4  ;;  %s117_s6 = sshll.u32 %s5070_s27, 4  ;;  %s105_s26 = int_to_ptr.vmem [resolvable:$true] %s104_s26  ;;  %s118_s6 = int_to_ptr.vmem [resolvable:$true] %s117_s6 }
  0x19   :  { %110 = dma.hbm_to_vmem [thread:$0]  %s103_s21, 1024, %s105_s26, [#allocation12], %s5063_s23, %s5063_s23, %s5064_s24  }
  0x1a   :  { %123 = dma.hbm_to_vmem [thread:$0]  %s116_s1, 1024, %s118_s6, [#allocation15], %s5063_s23, %s5063_s23, %s5064_s24  }
  0x1b   :  { %5047 = dma.done.wait [#allocation3], 256  }
  0x1c   :  { %5048 = vsyncadd [#allocation3], 4294967040 }
  0x1d   :  { %5049 = dma.done.wait [#allocation6], 16640  }
  0x1e   :  { %5050 = vsyncadd [#allocation6], 4294950656 }
  0x1f   :  { %5051 = dma.done.wait [#allocation9], 18432  }
  0x20   :  { %5052 = vsyncadd [#allocation9], 4294948864 }
  0x21   :  { %5053 = dma.done.wait [#allocation12], 1280  }
  0x22   :  { %5054 = vsyncadd [#allocation12], 4294966016 }
  0x23   :  { %5055 = dma.done.wait [#allocation15], 1024  }
  0x24   :  { %5056 = vsyncadd [#allocation15], 4294966272  ;;  %v4450_v0 = vld [vmem:[#allocation13 + $0x38] sm:$0xff]  ;;  %v4449_v1 = vld [vmem:[#allocation13 + $0x30] sm:$0xff]  ;;  %s3242_s30 = sshll.u32 %s5318_s9, 4  ;;  %s3243_s30 = int_to_ptr.hbm [resolvable:$true] %s3242_s30 }
  0x25   :  { %225 = vmatpush.bf16.msra.mxu0 %v4450_v0  ;;  %v4458_v2 = vld [vmem:[#allocation7 + $0x38] sm:$0xff]  ;;  %v4457_v6 = vld [vmem:[#allocation7 + $0x30] sm:$0xff]  ;;  %v4446_v10 = vld [vmem:[#allocation13 + $0x18] sm:$0xff] }
  0x26   :  { %v4466_v3 = vld [vmem:[#allocation7 + $0x78] sm:$0xff]  ;;  %422 = vmatpush.bf16.xpose.msra.mxu1 %v4458_v2  ;;  %v4465_v7 = vld [vmem:[#allocation7 + $0x70] sm:$0xff]  ;;  %v4456_v11 = vld [vmem:[#allocation7 + $0x28] sm:$0xff] }
  0x27   :  { %v4474_v4 = vld [vmem:[#allocation7 + $0xb8] sm:$0xff]  ;;  %483 = vmatpush.bf16.xpose.msra.mxu2 %v4466_v3  ;;  %v4447_v8 = vld [vmem:[#allocation13 + $0x20] sm:$0xff]  ;;  %v4464_v12 = vld [vmem:[#allocation7 + $0x68] sm:$0xff] }
  0x28   :  { %v4448_v5 = vld [vmem:[#allocation13 + $0x28] sm:$0xff]  ;;  %544 = vmatpush.bf16.xpose.msra.mxu3 %v4474_v4  ;;  %v4473_v9 = vld [vmem:[#allocation7 + $0xb0] sm:$0xff]  ;;  %v4445_v13 = vld [vmem:[#allocation13 + $0x10] sm:$0xff] }
  0x29   :  { %226 = vmatpush.bf16.msra.mxu0 %v4449_v1  ;;  %v4472_v14 = vld [vmem:[#allocation7 + $0xa8] sm:$0xff]  ;;  %v4444_v15 = vld [vmem:[#allocation13 + $0x8] sm:$0xff]  ;;  %v4443_v16 = vld [vmem:[#allocation13] sm:$0xff] }
  0x2a   :  { %v4455_v17 = vld [vmem:[#allocation7 + $0x20] sm:$0xff]  ;;  %v159_v20 = vld [vmem:[#allocation2 + $0x8] sm:$0xff]  ;;  %v4482_v22 = vld [vmem:[#allocation7 + $0xf8] sm:$0xff] }
  0x2b   :  { %v4463_v18 = vld [vmem:[#allocation7 + $0x60] sm:$0xff]  ;;  %v4454_v24 = vld [vmem:[#allocation7 + $0x18] sm:$0xff]  ;;  %v4481_v27 = vld [vmem:[#allocation7 + $0xf0] sm:$0xff] }
  0x2c   :  { %v158_v19 = vld [vmem:[#allocation2] sm:$0xff]  ;;  %v4462_v25 = vld [vmem:[#allocation7 + $0x58] sm:$0xff]  ;;  %v4453_v28 = vld [vmem:[#allocation7 + $0x10] sm:$0xff] }
  0x2d   :  { %227 = vmatpush.bf16.msra.mxu0 %v4448_v5  ;;  %v4471_v21 = vld [vmem:[#allocation7 + $0xa0] sm:$0xff]  ;;  %v160_v23 = vpack.c.bf16 %v159_v20, %v158_v19  ;;  %v4470_v26 = vld [vmem:[#allocation7 + $0x98] sm:$0xff]  ;;  %v4461_v29 = vld [vmem:[#allocation7 + $0x50] sm:$0xff] }
  0x2e   :  { %423 = vmatpush.bf16.xpose.msra.mxu1 %v4457_v6  ;;  %v4469_v30 = vld [vmem:[#allocation7 + $0x90] sm:$0xff]  ;;  %v4480_v31 = vld [vmem:[#allocation7 + $0xe8] sm:$0xff]  ;;  %v4479_v35 = vld [vmem:[#allocation7 + $0xe0] sm:$0xff] }
  0x2f   :  { %484 = vmatpush.bf16.xpose.msra.mxu2 %v4465_v7  ;;  %v4452_v32 = vld [vmem:[#allocation7 + $0x8] sm:$0xff]  ;;  %v4451_v36 = vld [vmem:[#allocation7] sm:$0xff]  ;;  %v4490_v39 = vld [vmem:[#allocation7 + $0x138] sm:$0xff] }
  0x30   :  { %545 = vmatpush.bf16.xpose.msra.mxu3 %v4473_v9  ;;  %v4460_v33 = vld [vmem:[#allocation7 + $0x48] sm:$0xff]  ;;  %v4459_v37 = vld [vmem:[#allocation7 + $0x40] sm:$0xff]  ;;  %v4478_v40 = vld [vmem:[#allocation7 + $0xd8] sm:$0xff] }
  0x31   :  { %228 = vmatpush.bf16.msra.mxu0 %v4447_v8  ;;  %v4468_v34 = vld [vmem:[#allocation7 + $0x88] sm:$0xff]  ;;  %v4467_v38 = vld [vmem:[#allocation7 + $0x80] sm:$0xff]  ;;  %v4498_v41 = vld [vmem:[#allocation7 + $0x178] sm:$0xff] }
  0x32   :  { %v4506_v42 = vld [vmem:[#allocation7 + $0x1b8] sm:$0xff]  ;;  %v4489_v43 = vld [vmem:[#allocation7 + $0x130] sm:$0xff]  ;;  %v4488_v47 = vld [vmem:[#allocation7 + $0x128] sm:$0xff] }
  0x33   :  { %v4477_v44 = vld [vmem:[#allocation7 + $0xd0] sm:$0xff]  ;;  %v4476_v48 = vld [vmem:[#allocation7 + $0xc8] sm:$0xff]  ;;  %v4487_v51 = vld [vmem:[#allocation7 + $0x120] sm:$0xff] }
  0x34   :  { %v4497_v45 = vld [vmem:[#allocation7 + $0x170] sm:$0xff]  ;;  %v4496_v49 = vld [vmem:[#allocation7 + $0x168] sm:$0xff]  ;;  %v4475_v52 = vld [vmem:[#allocation7 + $0xc0] sm:$0xff] }
  0x35   :  { %229 = vmatpush.bf16.msra.mxu0 %v4446_v10  ;;  %v4505_v46 = vld [vmem:[#allocation7 + $0x1b0] sm:$0xff]  ;;  %v4504_v50 = vld [vmem:[#allocation7 + $0x1a8] sm:$0xff]  ;;  %v4495_v53 = vld [vmem:[#allocation7 + $0x160] sm:$0xff] }
  0x36   :  { %424 = vmatpush.bf16.xpose.msra.mxu1 %v4456_v11  ;;  %v4514_v54 = vld [vmem:[#allocation7 + $0x1f8] sm:$0xff]  ;;  %v4503_v55 = vld [vmem:[#allocation7 + $0x1a0] sm:$0xff]  ;;  %v4513_v58 = vld [vmem:[#allocation7 + $0x1f0] sm:$0xff] }
  0x37   :  { %485 = vmatpush.bf16.xpose.msra.mxu2 %v4464_v12  ;;  %v4486_v56 = vld [vmem:[#allocation7 + $0x118] sm:$0xff]  ;;  %v4485_v60 = vld [vmem:[#allocation7 + $0x110] sm:$0xff]  ;;  %v4512_v62 = vld [vmem:[#allocation7 + $0x1e8] sm:$0xff] }
  0x38   :  { %546 = vmatpush.bf16.xpose.msra.mxu3 %v4472_v14  ;;  %v4494_v57 = vld [vmem:[#allocation7 + $0x158] sm:$0xff]  ;;  %v4493_v61 = vld [vmem:[#allocation7 + $0x150] sm:$0xff]  ;;  %v4511_v0 = vld [vmem:[#allocation7 + $0x1e0] sm:$0xff] }
  0x39   :  { %230 = vmatpush.bf16.msra.mxu0 %v4445_v13  ;;  %v4502_v59 = vld [vmem:[#allocation7 + $0x198] sm:$0xff]  ;;  %v4501_v63 = vld [vmem:[#allocation7 + $0x190] sm:$0xff]  ;;  %v4484_v3 = vld [vmem:[#allocation7 + $0x108] sm:$0xff] }
  0x3a   :  { %v4510_v1 = vld [vmem:[#allocation7 + $0x1d8] sm:$0xff]  ;;  %v4509_v2 = vld [vmem:[#allocation7 + $0x1d0] sm:$0xff]  ;;  %v4492_v4 = vld [vmem:[#allocation7 + $0x148] sm:$0xff] }
  0x3b   :  { %v4500_v5 = vld [vmem:[#allocation7 + $0x188] sm:$0xff]  ;;  %v4483_v7 = vld [vmem:[#allocation7 + $0x100] sm:$0xff]  ;;  %v239_v11 = vld [vmem:[#allocation5] sm:$0xff] }
  0x3c   :  { %v4508_v6 = vld [vmem:[#allocation7 + $0x1c8] sm:$0xff]  ;;  %v4491_v8 = vld [vmem:[#allocation7 + $0x140] sm:$0xff] }
  0x3d   :  { %231 = vmatpush.bf16.msra.mxu0 %v4444_v15  ;;  %v4499_v9 = vld [vmem:[#allocation7 + $0x180] sm:$0xff] }
  0x3e   :  { %425 = vmatpush.bf16.xpose.msra.mxu1 %v4455_v17  ;;  %v4507_v10 = vld [vmem:[#allocation7 + $0x1c0] sm:$0xff] }
  0x3f   :  { %486 = vmatpush.bf16.xpose.msra.mxu2 %v4463_v18 }
  0x40   :  { %547 = vmatpush.bf16.xpose.msra.mxu3 %v4471_v21 }
  0x41   :  { %232 = vmatpush.bf16.msra.mxu0 %v4443_v16  ;;  %v245_v16 = vld [vmem:[#allocation11] sm:$0xff] }
  0x44   :  { %233 = vmatmul.bf16.vlgmr.msra.gmra.mxu0 %v160_v23 }
  0x45   :  { %605 = vmatpush.bf16.xpose.msrb.mxu0 %v4482_v22 }
  0x46   :  { %426 = vmatpush.bf16.xpose.msra.mxu1 %v4454_v24 }
  0x47   :  { %487 = vmatpush.bf16.xpose.msra.mxu2 %v4462_v25 }
  0x48   :  { %548 = vmatpush.bf16.xpose.msra.mxu3 %v4470_v26 }
  0x4d   :  { %606 = vmatpush.bf16.xpose.msrb.mxu0 %v4481_v27 }
  0x4e   :  { %427 = vmatpush.bf16.xpose.msra.mxu1 %v4453_v28 }
  0x4f   :  { %488 = vmatpush.bf16.xpose.msra.mxu2 %v4461_v29 }
  0x50   :  { %549 = vmatpush.bf16.xpose.msra.mxu3 %v4469_v30 }
  0x55   :  { %607 = vmatpush.bf16.xpose.msrb.mxu0 %v4480_v31 }
  0x56   :  { %428 = vmatpush.bf16.xpose.msra.mxu1 %v4452_v32 }
  0x57   :  { %489 = vmatpush.bf16.xpose.msra.mxu2 %v4460_v33 }
  0x58   :  { %550 = vmatpush.bf16.xpose.msra.mxu3 %v4468_v34 }
  0x5d   :  { %608 = vmatpush.bf16.xpose.msrb.mxu0 %v4479_v35 }
  0x5e   :  { %429 = vmatpush.bf16.xpose.msra.mxu1 %v4451_v36 }
  0x5f   :  { %490 = vmatpush.bf16.xpose.msra.mxu2 %v4459_v37 }
  0x60   :  { %551 = vmatpush.bf16.xpose.msra.mxu3 %v4467_v38 }
  0x65   :  { %609 = vmatpush.bf16.xpose.msrb.mxu0 %v4478_v40 }
  0x66   :  { %666 = vmatpush.bf16.xpose.msrb.mxu1 %v4490_v39 }
  0x67   :  { %727 = vmatpush.bf16.xpose.msrb.mxu2 %v4498_v41 }
  0x68   :  { %788 = vmatpush.bf16.xpose.msrb.mxu3 %v4506_v42 }
  0x6d   :  { %610 = vmatpush.bf16.xpose.msrb.mxu0 %v4477_v44 }
  0x6e   :  { %667 = vmatpush.bf16.xpose.msrb.mxu1 %v4489_v43 }
  0x6f   :  { %728 = vmatpush.bf16.xpose.msrb.mxu2 %v4497_v45 }
  0x70   :  { %789 = vmatpush.bf16.xpose.msrb.mxu3 %v4505_v46 }
  0x75   :  { %611 = vmatpush.bf16.xpose.msrb.mxu0 %v4476_v48 }
  0x76   :  { %668 = vmatpush.bf16.xpose.msrb.mxu1 %v4488_v47 }
  0x77   :  { %729 = vmatpush.bf16.xpose.msrb.mxu2 %v4496_v49  ;;  %v4522_v49 = vld [vmem:[#allocation8 + $0x38] sm:$0xff] }
  0x78   :  { %790 = vmatpush.bf16.xpose.msrb.mxu3 %v4504_v50  ;;  %v4538_v50 = vld [vmem:[#allocation8 + $0xb8] sm:$0xff] }
  0x7d   :  { %612 = vmatpush.bf16.xpose.msrb.mxu0 %v4475_v52 }
  0x7e   :  { %669 = vmatpush.bf16.xpose.msrb.mxu1 %v4487_v51 }
  0x7f   :  { %730 = vmatpush.bf16.xpose.msrb.mxu2 %v4495_v53  ;;  %v4521_v53 = vld [vmem:[#allocation8 + $0x30] sm:$0xff] }
  0x80   :  { %791 = vmatpush.bf16.xpose.msrb.mxu3 %v4503_v55  ;;  %v4537_v55 = vld [vmem:[#allocation8 + $0xb0] sm:$0xff] }
  0x85   :  { %849 = vmatpush.bf16.xpose.msra.mxu0 %v4514_v54  ;;  %v4546_v54 = vld [vmem:[#allocation8 + $0xf8] sm:$0xff] }
  0x86   :  { %670 = vmatpush.bf16.xpose.msrb.mxu1 %v4486_v56  ;;  %v4545_v56 = vld [vmem:[#allocation8 + $0xf0] sm:$0xff] }
  0x87   :  { %731 = vmatpush.bf16.xpose.msrb.mxu2 %v4494_v57 }
  0x88   :  { %792 = vmatpush.bf16.xpose.msrb.mxu3 %v4502_v59  ;;  %v4520_v59 = vld [vmem:[#allocation8 + $0x28] sm:$0xff] }
  0x8d   :  { %850 = vmatpush.bf16.xpose.msra.mxu0 %v4513_v58 }
  0x8e   :  { %671 = vmatpush.bf16.xpose.msrb.mxu1 %v4485_v60 }
  0x8f   :  { %732 = vmatpush.bf16.xpose.msrb.mxu2 %v4493_v61  ;;  %v4536_v61 = vld [vmem:[#allocation8 + $0xa8] sm:$0xff] }
  0x90   :  { %793 = vmatpush.bf16.xpose.msrb.mxu3 %v4501_v63 }
  0x95   :  { %851 = vmatpush.bf16.xpose.msra.mxu0 %v4512_v62 }
  0x96   :  { %672 = vmatpush.bf16.xpose.msrb.mxu1 %v4484_v3  ;;  %v4519_v3 = vld [vmem:[#allocation8 + $0x20] sm:$0xff] }
  0x97   :  { %733 = vmatpush.bf16.xpose.msrb.mxu2 %v4492_v4  ;;  %v4535_v4 = vld [vmem:[#allocation8 + $0xa0] sm:$0xff] }
  0x98   :  { %794 = vmatpush.bf16.xpose.msrb.mxu3 %v4500_v5 }
  0x9d   :  { %852 = vmatpush.bf16.xpose.msra.mxu0 %v4511_v0  ;;  %v4544_v0 = vld [vmem:[#allocation8 + $0xe8] sm:$0xff] }
  0x9e   :  { %673 = vmatpush.bf16.xpose.msrb.mxu1 %v4483_v7 }
  0x9f   :  { %734 = vmatpush.bf16.xpose.msrb.mxu2 %v4491_v8 }
  0xa0   :  { %795 = vmatpush.bf16.xpose.msrb.mxu3 %v4499_v9 }
  0xa5   :  { %853 = vmatpush.bf16.xpose.msra.mxu0 %v4510_v1 }
  0xad   :  { %854 = vmatpush.bf16.xpose.msra.mxu0 %v4509_v2 }
  0xb5   :  { %855 = vmatpush.bf16.xpose.msra.mxu0 %v4508_v6  ;;  %v4543_v6 = vld [vmem:[#allocation8 + $0xe0] sm:$0xff] }
  0xbd   :  { %856 = vmatpush.bf16.xpose.msra.mxu0 %v4507_v10  ;;  %v4518_v10 = vld [vmem:[#allocation8 + $0x18] sm:$0xff] }
  0xc1   :  { %v234_v12 = vpop.f32.mrf.mxu0 }
  0xc2   :  { %v241_v13 = vadd.f32 %v239_v11, %v234_v12  ;;  %v4534_v12 = vld [vmem:[#allocation8 + $0x98] sm:$0xff] }
  0xc4   :  { %v243_v14 = vpack.c.bf16 %v241_v13, %v241_v13 }
  0xc6   :  { %430 = vmatmul.bf16.vlgmr.msra.gmra.mxu1 %v243_v14  ;;  %491 = vmatmul.bf16.vlgmr.msra.gmra.mxu2 %v243_v14 }
  0xc7   :  { %552 = vmatmul.bf16.vlgmr.msra.gmra.mxu3 %v243_v14  ;;  %613 = vmatmul.bf16.vlgmr.msrb.gmra.mxu0 %v243_v14 }
  0xc8   :  { %1118 = vmatpush.bf16.msra.mxu2 %v4522_v49  ;;  %1240 = vmatpush.bf16.msra.mxu3 %v4538_v50  ;;  %v4553_v49 = vld [vmem:[#allocation8 + $0x130] sm:$0xff]  ;;  %v4524_v50 = vld [vmem:[#allocation8 + $0x48] sm:$0xff] }
  0xc9   :  { %v5170_v15 = vpop.f32.mrf.mxu0  ;;  %1301 = vmatpush.bf16.msrb.mxu0 %v4546_v54  ;;  %v4552_v54 = vld [vmem:[#allocation8 + $0x128] sm:$0xff] }
  0xcc   :  { %1119 = vmatpush.bf16.msra.mxu2 %v4521_v53  ;;  %1241 = vmatpush.bf16.msra.mxu3 %v4537_v55  ;;  %v4575_v53 = vld [vmem:[#allocation8 + $0x1e0] sm:$0xff] }
  0xcd   :  { %1302 = vmatpush.bf16.msrb.mxu0 %v4545_v56  ;;  %v4523_v55 = vld [vmem:[#allocation8 + $0x40] sm:$0xff]  ;;  %v4564_v56 = vld [vmem:[#allocation8 + $0x188] sm:$0xff] }
  0xd0   :  { %1120 = vmatpush.bf16.msra.mxu2 %v4520_v59  ;;  %1242 = vmatpush.bf16.msra.mxu3 %v4536_v61  ;;  %v4563_v59 = vld [vmem:[#allocation8 + $0x180] sm:$0xff]  ;;  %v4550_v61 = vld [vmem:[#allocation8 + $0x118] sm:$0xff] }
  0xd1   :  { %1303 = vmatpush.bf16.msrb.mxu0 %v4544_v0  ;;  %v4549_v0 = vld [vmem:[#allocation8 + $0x110] sm:$0xff] }
  0xd4   :  { %1121 = vmatpush.bf16.msra.mxu2 %v4519_v3  ;;  %1243 = vmatpush.bf16.msra.mxu3 %v4535_v4  ;;  %v4548_v3 = vld [vmem:[#allocation8 + $0x108] sm:$0xff]  ;;  %v4547_v4 = vld [vmem:[#allocation8 + $0x100] sm:$0xff] }
  0xd5   :  { %1304 = vmatpush.bf16.msrb.mxu0 %v4543_v6 }
  0xd6   :  { %674 = vmatmul.bf16.vlgmr.msrb.gmra.mxu1 %v243_v14  ;;  %735 = vmatmul.bf16.vlgmr.msrb.gmra.mxu2 %v243_v14 }
  0xd7   :  { %796 = vmatmul.bf16.vlgmr.msrb.gmra.mxu3 %v243_v14  ;;  %857 = vmatmul.bf16.vlgmr.msra.gmra.mxu0 %v243_v14 }
  0xd8   :  { %1122 = vmatpush.bf16.msra.mxu2 %v4518_v10  ;;  %1244 = vmatpush.bf16.msra.mxu3 %v4534_v12  ;;  %v4561_v12 = vld [vmem:[#allocation8 + $0x170] sm:$0xff] }
 0x143   :  { %v431_v17 = vpop.f32.mrf.mxu1 }
 0x144   :  { %v432_v18 = vadd.f32 %v431_v17, %v245_v16  ;;  %v614_v19 = vpop.f32.mrf.mxu0  ;;  %v4517_v17 = vld [vmem:[#allocation8 + $0x10] sm:$0xff] }
 0x145   :  { %v615_v28 = vadd.f32 %v614_v19, %v245_v16  ;;  %1123 = vmatpush.bf16.msra.mxu2 %v4517_v17 }
 0x146   :  { %862 = vmax.xlane.f32.xlu0 %v432_v18 }
 0x149   :  { %v492_v20 = vpop.f32.mrf.mxu2 }
 0x14a   :  { %v553_v21 = vpop.f32.mrf.mxu3  ;;  %v493_v24 = vadd.f32 %v492_v20, %v245_v16 }
 0x14b   :  { %v554_v22 = vadd.f32 %v553_v21, %v245_v16  ;;  %v433_v23 = vpop.f32.mrf.mxu1  ;;  %v4541_v21 = vld [vmem:[#allocation8 + $0xd0] sm:$0xff] }
 0x14c   :  { %v616_v25 = vpop.f32.mrf.mxu0  ;;  %v4516_v23 = vld [vmem:[#allocation8 + $0x8] sm:$0xff] }
 0x14d   :  { %866 = vmax.xlane.f32.xlu1 %v554_v22  ;;  %1124 = vmatpush.bf16.msra.mxu2 %v4516_v23 }
 0x14e   :  { %864 = vmax.xlane.f32.xlu0 %v493_v24 }
 0x151   :  { %v494_v26 = vpop.f32.mrf.mxu2 }
 0x152   :  { %v555_v27 = vpop.f32.mrf.mxu3  ;;  %v4532_v26 = vld [vmem:[#allocation8 + $0x88] sm:$0xff] }
 0x153   :  { %v675_v29 = vpop.f32.mrf.mxu1 }
 0x154   :  { %v5172_v30 = vadd.f32 %v675_v29, %v245_v16  ;;  %v858_v31 = vpop.f32.mrf.mxu0  ;;  %v4515_v29 = vld [vmem:[#allocation8] sm:$0xff] }
 0x155   :  { %868 = vmax.xlane.f32.xlu1 %v615_v28  ;;  %v5175_v35 = vadd.f32 %v858_v31, %v245_v16  ;;  %v4531_v31 = vld [vmem:[#allocation8 + $0x80] sm:$0xff]  ;;  %1125 = vmatpush.bf16.msra.mxu2 %v4515_v29  ;;  %v4610_v29 = vld [vmem:[#allocation7 + $0x278] sm:$0xff] }
 0x156   :  { %870 = vmax.xlane.f32.xlu0 %v5172_v30 }
 0x159   :  { %v736_v32 = vpop.f32.mrf.mxu2 }
 0x15a   :  { %v737_v33 = vadd.f32 %v736_v32, %v245_v16  ;;  %v797_v34 = vpop.f32.mrf.mxu3  ;;  %v4570_v32 = vld [vmem:[#allocation8 + $0x1b8] sm:$0xff] }
 0x15b   :  { %v677_v36 = vpop.f32.mrf.mxu1  ;;  %v5178_v39 = vadd.f32 %v797_v34, %v245_v16  ;;  %v4542_v16 = vld [vmem:[#allocation8 + $0xd8] sm:$0xff] }
 0x15c   :  { %v860_v37 = vpop.f32.mrf.mxu0  ;;  %872 = vmax.xlane.f32.xlu2 %v737_v33  ;;  %1305 = vmatpush.bf16.msrb.mxu0 %v4542_v16 }
 0x15d   :  { %876 = vmax.xlane.f32.xlu1 %v5175_v35  ;;  %v4529_v37 = vld [vmem:[#allocation8 + $0x70] sm:$0xff] }
 0x160   :  { %1306 = vmatpush.bf16.msrb.mxu0 %v4541_v21 }
 0x161   :  { %v738_v38 = vpop.f32.mrf.mxu2 }
 0x162   :  { %v799_v40 = vpop.f32.mrf.mxu3  ;;  %v4569_v38 = vld [vmem:[#allocation8 + $0x1b0] sm:$0xff] }
 0x163   :  { %v4568_v40 = vld [vmem:[#allocation8 + $0x1a8] sm:$0xff] }
 0x164   :  { %874 = vmax.xlane.f32.xlu2 %v5178_v39 }
 0x1b9   :  { %v863_v41 = vpop.xlane.xlu0 %862 }
 0x1ba   :  { %v878_v42 = vsub.f32 %v432_v18, %v863_v41  ;;  %v4533_v18 = vld [vmem:[#allocation8 + $0x90] sm:$0xff]  ;;  %v4527_v41 = vld [vmem:[#allocation8 + $0x60] sm:$0xff] }
 0x1bb   :  { %1245 = vmatpush.bf16.msra.mxu3 %v4533_v18  ;;  %v4602_v18 = vld [vmem:[#allocation7 + $0x238] sm:$0xff] }
 0x1bc   :  { %v886_v43 = vmul.f32 1.442695, %v878_v42  ;;  %v4526_v42 = vld [vmem:[#allocation8 + $0x58] sm:$0xff] }
 0x1be   :  { %4754 = vpow2.f32 %v886_v43  ;;  %v4567_v43 = vld [vmem:[#allocation8 + $0x1a0] sm:$0xff] }
 0x1bf   :  { %1246 = vmatpush.bf16.msra.mxu3 %v4532_v26 }
 0x1c0   :  { %v867_v44 = vpop.xlane.xlu1 %866 }
 0x1c1   :  { %v880_v45 = vsub.f32 %v554_v22, %v867_v44  ;;  %v865_v46 = vpop.xlane.xlu0 %864  ;;  %v4577_v44 = vld [vmem:[#allocation8 + $0x1f0] sm:$0xff] }
 0x1c2   :  { %v879_v47 = vsub.f32 %v493_v24, %v865_v46  ;;  %v4525_v46 = vld [vmem:[#allocation8 + $0x50] sm:$0xff] }
 0x1c3   :  { %v890_v48 = vmul.f32 1.442695, %v880_v45  ;;  %1247 = vmatpush.bf16.msra.mxu3 %v4531_v31  ;;  %v4554_v45 = vld [vmem:[#allocation8 + $0x138] sm:$0xff] }
 0x1c4   :  { %v5181_v51 = vpop.eup %4754  ;;  %v888_v52 = vmul.f32 1.442695, %v879_v47  ;;  %1362 = vmatpush.bf16.msra.mxu1 %v4554_v45  ;;  %v4566_v47 = vld [vmem:[#allocation8 + $0x198] sm:$0xff] }
 0x1c5   :  { %4756 = vpow2.f32 %v890_v48  ;;  %902 = vadd.xlane.f32.xlu2 %v5181_v51  ;;  %v4576_v48 = vld [vmem:[#allocation8 + $0x1e8] sm:$0xff]  ;;  %v4558_v31 = vld [vmem:[#allocation8 + $0x158] sm:$0xff] }
 0x1c6   :  { %4758 = vpow2.f32 %v888_v52  ;;  %v4565_v52 = vld [vmem:[#allocation8 + $0x190] sm:$0xff] }
 0x1c7   :  { %1484 = vmatpush.bf16.msrb.mxu3 %v4570_v32 }
 0x1c8   :  { %v869_v57 = vpop.xlane.xlu1 %868  ;;  %1363 = vmatpush.bf16.msra.mxu1 %v4553_v49  ;;  %v4599_v49 = vld [vmem:[#allocation7 + $0x220] sm:$0xff] }
 0x1c9   :  { %v881_v58 = vsub.f32 %v615_v28, %v869_v57  ;;  %v871_v60 = vpop.xlane.xlu0 %870  ;;  %v4540_v28 = vld [vmem:[#allocation8 + $0xc8] sm:$0xff]  ;;  %v4574_v57 = vld [vmem:[#allocation8 + $0x1d8] sm:$0xff] }
 0x1ca   :  { %v882_v2 = vsub.f32 %v5172_v30, %v871_v60  ;;  %v4530_v30 = vld [vmem:[#allocation8 + $0x78] sm:$0xff]  ;;  %1307 = vmatpush.bf16.msrb.mxu0 %v4540_v28  ;;  %v4573_v60 = vld [vmem:[#allocation8 + $0x1d0] sm:$0xff] }
 0x1cb   :  { %v5184_v62 = vpop.eup %4756  ;;  %v892_v63 = vmul.f32 1.442695, %v881_v58  ;;  %1179 = vmatpush.bf16.msrb.mxu2 %v4530_v30  ;;  %1485 = vmatpush.bf16.msrb.mxu3 %v4569_v38  ;;  %v4551_v58 = vld [vmem:[#allocation8 + $0x120] sm:$0xff]  ;;  %v4600_v38 = vld [vmem:[#allocation7 + $0x228] sm:$0xff] }
 0x1cc   :  { %v5186_v1 = vpop.eup %4758  ;;  %906 = vadd.xlane.f32.xlu1 %v5184_v62  ;;  %v894_v9 = vmul.f32 1.442695, %v882_v2  ;;  %1364 = vmatpush.bf16.msra.mxu1 %v4552_v54  ;;  %v4571_v2 = vld [vmem:[#allocation8 + $0x1c0] sm:$0xff]  ;;  %v4598_v54 = vld [vmem:[#allocation7 + $0x218] sm:$0xff] }
 0x1cd   :  { %4760 = vpow2.f32 %v892_v63  ;;  %904 = vadd.xlane.f32.xlu0 %v5186_v1  ;;  %v4572_v63 = vld [vmem:[#allocation8 + $0x1c8] sm:$0xff] }
 0x1cf   :  { %v873_v5 = vpop.xlane.xlu2 %872  ;;  %1180 = vmatpush.bf16.msrb.mxu2 %v4529_v37  ;;  %1486 = vmatpush.bf16.msrb.mxu3 %v4568_v40 }
 0x1d0   :  { %v883_v7 = vsub.f32 %v737_v33, %v873_v5  ;;  %v877_v8 = vpop.xlane.xlu1 %876  ;;  %v4539_v33 = vld [vmem:[#allocation8 + $0xc0] sm:$0xff]  ;;  %1365 = vmatpush.bf16.msra.mxu1 %v4551_v58 }
 0x1d1   :  { %v885_v14 = vsub.f32 %v5175_v35, %v877_v8  ;;  %v4578_v35 = vld [vmem:[#allocation8 + $0x1f8] sm:$0xff]  ;;  %1308 = vmatpush.bf16.msrb.mxu0 %v4539_v33  ;;  %v4585_v58 = vld [vmem:[#allocation14 + $0x30] sm:$0xff] }
 0x1d2   :  { %v896_v11 = vmul.f32 1.442695, %v883_v7 }
 0x1d3   :  { %v5191_v13 = vpop.eup %4760  ;;  %v900_v19 = vmul.f32 1.442695, %v885_v14  ;;  %1487 = vmatpush.bf16.msrb.mxu3 %v4567_v43 }
 0x1d4   :  { %4762 = vpow2.f32 %v896_v11  ;;  %908 = vadd.xlane.f32.xlu2 %v5191_v13  ;;  %1366 = vmatpush.bf16.msra.mxu1 %v4550_v61  ;;  %v4604_v61 = vld [vmem:[#allocation7 + $0x248] sm:$0xff] }
 0x1d5   :  { %4764 = vpow2.f32 %v894_v9  ;;  %1545 = vmatpush.bf16.msra.mxu0 %v4578_v35  ;;  %v4562_v9 = vld [vmem:[#allocation8 + $0x178] sm:$0xff] }
 0x1d6   :  { %4766 = vpow2.f32 %v900_v19 }
 0x1d7   :  { %v875_v20 = vpop.xlane.xlu2 %874  ;;  %1488 = vmatpush.bf16.msrb.mxu3 %v4566_v47 }
 0x1d8   :  { %v884_v22 = vsub.f32 %v5178_v39, %v875_v20  ;;  %v4528_v39 = vld [vmem:[#allocation8 + $0x68] sm:$0xff]  ;;  %1367 = vmatpush.bf16.msra.mxu1 %v4549_v0  ;;  %v240_v0 = vld [vmem:[#allocation5 + $0x8] sm:$0xff] }
 0x1d9   :  { %1181 = vmatpush.bf16.msrb.mxu2 %v4528_v39  ;;  %1546 = vmatpush.bf16.msra.mxu0 %v4577_v44  ;;  %v4560_v20 = vld [vmem:[#allocation8 + $0x168] sm:$0xff]  ;;  %v4609_v39 = vld [vmem:[#allocation7 + $0x270] sm:$0xff] }
 0x1da   :  { %v5196_v24 = vpop.eup %4762  ;;  %v898_v25 = vmul.f32 1.442695, %v884_v22 }
 0x1db   :  { %v5198_v27 = vpop.eup %4764  ;;  %912 = vadd.xlane.f32.xlu0 %v5196_v24  ;;  %1489 = vmatpush.bf16.msrb.mxu3 %v4565_v52 }
 0x1dc   :  { %4768 = vpow2.f32 %v898_v25  ;;  %910 = vadd.xlane.f32.xlu2 %v5198_v27  ;;  %v5202_v34 = vpop.eup %4766  ;;  %1368 = vmatpush.bf16.msra.mxu1 %v4548_v3  ;;  %v4583_v3 = vld [vmem:[#allocation14 + $0x20] sm:$0xff] }
 0x1dd   :  { %1182 = vmatpush.bf16.msrb.mxu2 %v4527_v41  ;;  %1547 = vmatpush.bf16.msra.mxu0 %v4576_v48  ;;  %v4556_v41 = vld [vmem:[#allocation8 + $0x148] sm:$0xff] }
 0x1df   :  { %1490 = vmatpush.bf16.msrb.mxu3 %v4564_v56  ;;  %v4606_v56 = vld [vmem:[#allocation7 + $0x258] sm:$0xff] }
 0x1e0   :  { %1369 = vmatpush.bf16.msra.mxu1 %v4547_v4  ;;  %v4582_v4 = vld [vmem:[#allocation14 + $0x18] sm:$0xff] }
 0x1e1   :  { %1183 = vmatpush.bf16.msrb.mxu2 %v4526_v42  ;;  %1548 = vmatpush.bf16.msra.mxu0 %v4575_v53 }
 0x1e2   :  { %v5204_v36 = vpop.eup %4768 }
 0x1e3   :  { %914 = vadd.xlane.f32.xlu1 %v5204_v36  ;;  %916 = vadd.xlane.f32.xlu0 %v5202_v34 }
 0x1e4   :  { %1491 = vmatpush.bf16.msrb.mxu3 %v4563_v59  ;;  %v4584_v59 = vld [vmem:[#allocation14 + $0x28] sm:$0xff] }
 0x1e5   :  { %1184 = vmatpush.bf16.msrb.mxu2 %v4525_v46  ;;  %1549 = vmatpush.bf16.msra.mxu0 %v4574_v57  ;;  %v4555_v46 = vld [vmem:[#allocation8 + $0x140] sm:$0xff]  ;;  %v4605_v57 = vld [vmem:[#allocation7 + $0x250] sm:$0xff] }
 0x1e9   :  { %1185 = vmatpush.bf16.msrb.mxu2 %v4524_v50  ;;  %1550 = vmatpush.bf16.msra.mxu0 %v4573_v60  ;;  %v4608_v50 = vld [vmem:[#allocation7 + $0x268] sm:$0xff]  ;;  %v4595_v60 = vld [vmem:[#allocation7 + $0x200] sm:$0xff] }
 0x1ed   :  { %1186 = vmatpush.bf16.msrb.mxu2 %v4523_v55  ;;  %1551 = vmatpush.bf16.msra.mxu0 %v4572_v63  ;;  %v4607_v55 = vld [vmem:[#allocation7 + $0x260] sm:$0xff]  ;;  %v4634_v63 = vld [vmem:[#allocation7 + $0x338] sm:$0xff] }
 0x1f1   :  { %1552 = vmatpush.bf16.msra.mxu0 %v4571_v2  ;;  %v242_v2 = vadd.f32 %v240_v0, %v5170_v15  ;;  %v4641_v15 = vld [vmem:[#allocation7 + $0x370] sm:$0xff]  ;;  %v4647_v0 = vld [vmem:[#allocation7 + $0x3a0] sm:$0xff] }
 0x238   :  { %v903_v5 = vpop.xlane.xlu2 %902 }
 0x239   :  { %4770 = vrcp.f32 %v903_v5  ;;  %v4603_v5 = vld [vmem:[#allocation7 + $0x240] sm:$0xff] }
 0x23f   :  { %v4771_v6 = vpop.eup %4770  ;;  %v907_v7 = vpop.xlane.xlu1 %906 }
 0x240   :  { %v926_v8 = vmul.f32 %v4771_v6, %v5181_v51  ;;  %4772 = vrcp.f32 %v907_v7  ;;  %v905_v11 = vpop.xlane.xlu0 %904  ;;  %v4559_v51 = vld [vmem:[#allocation8 + $0x160] sm:$0xff]  ;;  %v5217_v6 = vpack.c.bf16 %v242_v2, %v242_v2  ;;  %v4633_v7 = vld [vmem:[#allocation7 + $0x330] sm:$0xff] }
 0x241   :  { %4774 = vrcp.f32 %v905_v11  ;;  %v4632_v11 = vld [vmem:[#allocation7 + $0x328] sm:$0xff]  ;;  %v4589_v2 = vld [vmem:[#allocation10 + $0x10] sm:$0xff] }
 0x242   :  { %v934_v10 = vpack.c.bf16 %v926_v8, %v926_v8  ;;  %v4642_v8 = vld [vmem:[#allocation7 + $0x378] sm:$0xff] }
 0x244   :  { %1126 = vmatmul.bf16.vlgmr.msra.gmra.mxu2 %v934_v10  ;;  %v4580_v10 = vld [vmem:[#allocation14 + $0x8] sm:$0xff] }
 0x245   :  { %1423 = vmatpush.bf16.msra.mxu2 %v4562_v9  ;;  %v4581_v9 = vld [vmem:[#allocation14 + $0x10] sm:$0xff] }
 0x246   :  { %v4773_v14 = vpop.eup %4772 }
 0x247   :  { %v928_v16 = vmul.f32 %v4773_v14, %v5184_v62  ;;  %v909_v17 = vpop.xlane.xlu2 %908  ;;  %v4775_v21 = vpop.eup %4774  ;;  %v4601_v62 = vld [vmem:[#allocation7 + $0x230] sm:$0xff]  ;;  %v4618_v14 = vld [vmem:[#allocation7 + $0x2b8] sm:$0xff] }
 0x248   :  { %4776 = vrcp.f32 %v909_v17  ;;  %v927_v25 = vmul.f32 %v4775_v21, %v5186_v1  ;;  %v4557_v1 = vld [vmem:[#allocation8 + $0x150] sm:$0xff]  ;;  %v4640_v17 = vld [vmem:[#allocation7 + $0x368] sm:$0xff] }
 0x249   :  { %1424 = vmatpush.bf16.msra.mxu2 %v4561_v12  ;;  %v936_v19 = vpack.c.bf16 %v928_v16, %v928_v16  ;;  %v4579_v12 = vld [vmem:[#allocation14] sm:$0xff]  ;;  %v4631_v16 = vld [vmem:[#allocation7 + $0x320] sm:$0xff]  ;;  %v4616_v21 = vld [vmem:[#allocation7 + $0x2a8] sm:$0xff] }
 0x24a   :  { %v935_v32 = vpack.c.bf16 %v927_v25, %v927_v25  ;;  %v4628_v25 = vld [vmem:[#allocation7 + $0x308] sm:$0xff] }
 0x24b   :  { %1248 = vmatmul.bf16.vlgmr.msra.gmra.mxu3 %v936_v19  ;;  %v4630_v19 = vld [vmem:[#allocation7 + $0x318] sm:$0xff] }
 0x24c   :  { %1917 = vmatpush.bf16.xpose.msra.mxu3 %v4602_v18  ;;  %v4617_v18 = vld [vmem:[#allocation7 + $0x2b0] sm:$0xff] }
 0x24d   :  { %1425 = vmatpush.bf16.msra.mxu2 %v4560_v20  ;;  %v4639_v20 = vld [vmem:[#allocation7 + $0x360] sm:$0xff] }
 0x24e   :  { %v4777_v22 = vpop.eup %4776  ;;  %v913_v23 = vpop.xlane.xlu0 %912 }
 0x24f   :  { %v929_v26 = vmul.f32 %v4777_v22, %v5191_v13  ;;  %v911_v28 = vpop.xlane.xlu2 %910  ;;  %v4638_v22 = vld [vmem:[#allocation7 + $0x358] sm:$0xff] }
 0x250   :  { %4778 = vrcp.f32 %v911_v28  ;;  %v4614_v28 = vld [vmem:[#allocation7 + $0x298] sm:$0xff] }
 0x251   :  { %1426 = vmatpush.bf16.msra.mxu2 %v4559_v51  ;;  %v937_v30 = vpack.c.bf16 %v929_v26, %v929_v26  ;;  %4780 = vrcp.f32 %v913_v23  ;;  %v4629_v51 = vld [vmem:[#allocation7 + $0x310] sm:$0xff]  ;;  %v4615_v23 = vld [vmem:[#allocation7 + $0x2a0] sm:$0xff] }
 0x252   :  { %v4637_v26 = vld [vmem:[#allocation7 + $0x350] sm:$0xff] }
 0x253   :  { %1309 = vmatmul.bf16.vlgmr.msrb.gmra.mxu0 %v937_v30  ;;  %v4613_v30 = vld [vmem:[#allocation7 + $0x290] sm:$0xff] }
 0x254   :  { %1918 = vmatpush.bf16.xpose.msra.mxu3 %v4601_v62  ;;  %1978 = vmatpush.bf16.xpose.msrb.mxu0 %v4610_v29  ;;  %v4627_v62 = vld [vmem:[#allocation7 + $0x300] sm:$0xff]  ;;  %v4636_v29 = vld [vmem:[#allocation7 + $0x348] sm:$0xff] }
 0x255   :  { %1187 = vmatmul.bf16.vlgmr.msrb.gmra.mxu2 %v935_v32 }
 0x256   :  { %v4779_v33 = vpop.eup %4778  ;;  %1427 = vmatpush.bf16.msra.mxu2 %v4558_v31  ;;  %v917_v35 = vpop.xlane.xlu0 %916  ;;  %v4635_v31 = vld [vmem:[#allocation7 + $0x340] sm:$0xff] }
 0x257   :  { %v915_v37 = vpop.xlane.xlu1 %914  ;;  %v930_v13 = vmul.f32 %v4779_v33, %v5198_v27  ;;  %4782 = vrcp.f32 %v917_v35  ;;  %v4781_v42 = vpop.eup %4780  ;;  %v4612_v33 = vld [vmem:[#allocation7 + $0x288] sm:$0xff] }
 0x258   :  { %4784 = vrcp.f32 %v915_v37  ;;  %v931_v47 = vmul.f32 %v4781_v42, %v5196_v24  ;;  %v4586_v24 = vld [vmem:[#allocation14 + $0x38] sm:$0xff]  ;;  %v4594_v42 = vld [vmem:[#allocation10 + $0x38] sm:$0xff] }
 0x259   :  { %v938_v40 = vpack.c.bf16 %v930_v13, %v930_v13  ;;  %1634 = vmatpush.bf16.msrb.mxu1 %v4586_v24  ;;  %v4650_v24 = vld [vmem:[#allocation7 + $0x3b8] sm:$0xff] }
 0x25a   :  { %1428 = vmatpush.bf16.msra.mxu2 %v4557_v1  ;;  %v939_v53 = vpack.c.bf16 %v931_v47, %v931_v47  ;;  %v4611_v1 = vld [vmem:[#allocation7 + $0x280] sm:$0xff] }
 0x25b   :  { %1370 = vmatmul.bf16.vlgmr.msra.gmra.mxu1 %v938_v40 }
 0x25c   :  { %1919 = vmatpush.bf16.xpose.msra.mxu3 %v4600_v38  ;;  %1979 = vmatpush.bf16.xpose.msrb.mxu0 %v4609_v39 }
 0x25d   :  { %v4783_v43 = vpop.eup %4782  ;;  %1635 = vmatpush.bf16.msrb.mxu1 %v4585_v58  ;;  %v4592_v58 = vld [vmem:[#allocation10 + $0x28] sm:$0xff] }
 0x25e   :  { %v4785_v44 = vpop.eup %4784  ;;  %v933_v45 = vmul.f32 %v4783_v43, %v5202_v34  ;;  %1429 = vmatpush.bf16.msra.mxu2 %v4556_v41  ;;  %v4597_v34 = vld [vmem:[#allocation7 + $0x210] sm:$0xff] }
 0x25f   :  { %v932_v27 = vmul.f32 %v4785_v44, %v5204_v36  ;;  %v4596_v36 = vld [vmem:[#allocation7 + $0x208] sm:$0xff] }
 0x260   :  { %v941_v48 = vpack.c.bf16 %v933_v45, %v933_v45 }
 0x261   :  { %v940_v52 = vpack.c.bf16 %v932_v27, %v932_v27  ;;  %1636 = vmatpush.bf16.msrb.mxu1 %v4584_v59  ;;  %v4593_v27 = vld [vmem:[#allocation10 + $0x30] sm:$0xff] }
 0x262   :  { %1430 = vmatpush.bf16.msra.mxu2 %v4555_v46  ;;  %v4649_v59 = vld [vmem:[#allocation7 + $0x3b0] sm:$0xff] }
 0x263   :  { %1492 = vmatmul.bf16.vlgmr.msrb.gmra.mxu3 %v940_v52  ;;  %1553 = vmatmul.bf16.vlgmr.msra.gmra.mxu0 %v941_v48 }
 0x264   :  { %1920 = vmatpush.bf16.xpose.msra.mxu3 %v4599_v49  ;;  %1980 = vmatpush.bf16.xpose.msrb.mxu0 %v4608_v50 }
 0x265   :  { %1431 = vmatmul.bf16.vlgmr.msra.gmra.mxu2 %v939_v53  ;;  %1637 = vmatpush.bf16.msrb.mxu1 %v4583_v3  ;;  %v5224_v3 = vld [vmem:[#allocation11 + $0x8] sm:$0xff] }
 0x266   :  { %1712 = vmatpush.bf16.xpose.msrb.mxu2 %v4594_v42  ;;  %v4654_v42 = vld [vmem:[#allocation7 + $0x3d8] sm:$0xff] }
 0x269   :  { %1638 = vmatpush.bf16.msrb.mxu1 %v4582_v4 }
 0x26c   :  { %1921 = vmatpush.bf16.xpose.msra.mxu3 %v4598_v54  ;;  %1981 = vmatpush.bf16.xpose.msrb.mxu0 %v4607_v55 }
 0x26d   :  { %1639 = vmatpush.bf16.msrb.mxu1 %v4581_v9  ;;  %v4588_v9 = vld [vmem:[#allocation10 + $0x8] sm:$0xff] }
 0x26e   :  { %1713 = vmatpush.bf16.xpose.msrb.mxu2 %v4593_v27 }
 0x271   :  { %1640 = vmatpush.bf16.msrb.mxu1 %v4580_v10 }
 0x274   :  { %1922 = vmatpush.bf16.xpose.msra.mxu3 %v4597_v34  ;;  %1982 = vmatpush.bf16.xpose.msrb.mxu0 %v4606_v56 }
 0x275   :  { %1641 = vmatpush.bf16.msrb.mxu1 %v4579_v12  ;;  %v4587_v12 = vld [vmem:[#allocation10] sm:$0xff] }
 0x276   :  { %1714 = vmatpush.bf16.xpose.msrb.mxu2 %v4592_v58 }
 0x279   :  { %2039 = vmatpush.bf16.xpose.msra.mxu1 %v4618_v14  ;;  %v4626_v14 = vld [vmem:[#allocation7 + $0x2f8] sm:$0xff] }
 0x27c   :  { %1923 = vmatpush.bf16.xpose.msra.mxu3 %v4596_v36  ;;  %1983 = vmatpush.bf16.xpose.msrb.mxu0 %v4605_v57 }
 0x281   :  { %2040 = vmatpush.bf16.xpose.msra.mxu1 %v4617_v18  ;;  %v4625_v18 = vld [vmem:[#allocation7 + $0x2f0] sm:$0xff] }
 0x284   :  { %1924 = vmatpush.bf16.xpose.msra.mxu3 %v4595_v60  ;;  %1984 = vmatpush.bf16.xpose.msrb.mxu0 %v4604_v61  ;;  %v4591_v60 = vld [vmem:[#allocation10 + $0x20] sm:$0xff]  ;;  %v4648_v61 = vld [vmem:[#allocation7 + $0x3a8] sm:$0xff] }
 0x285   :  { %1715 = vmatpush.bf16.xpose.msrb.mxu2 %v4591_v60 }
 0x289   :  { %2041 = vmatpush.bf16.xpose.msra.mxu1 %v4616_v21  ;;  %v4623_v21 = vld [vmem:[#allocation7 + $0x2e0] sm:$0xff] }
 0x28b   :  { %1925 = vmatmul.bf16.vlgmr.msra.gmra.mxu3 %v5217_v6 }
 0x28c   :  { %2161 = vmatpush.bf16.xpose.msrb.mxu3 %v4634_v63  ;;  %1985 = vmatpush.bf16.xpose.msrb.mxu0 %v4603_v5  ;;  %v4590_v63 = vld [vmem:[#allocation10 + $0x18] sm:$0xff] }
 0x28d   :  { %1716 = vmatpush.bf16.xpose.msrb.mxu2 %v4590_v63  ;;  %v4646_v5 = vld [vmem:[#allocation7 + $0x398] sm:$0xff] }
 0x291   :  { %2042 = vmatpush.bf16.xpose.msra.mxu1 %v4615_v23 }
 0x293   :  { %1986 = vmatmul.bf16.vlgmr.msrb.gmra.mxu0 %v5217_v6 }
 0x294   :  { %2162 = vmatpush.bf16.xpose.msrb.mxu3 %v4633_v7  ;;  %2222 = vmatpush.bf16.xpose.msra.mxu0 %v4642_v8 }
 0x295   :  { %1717 = vmatpush.bf16.xpose.msrb.mxu2 %v4589_v2 }
 0x299   :  { %2043 = vmatpush.bf16.xpose.msra.mxu1 %v4614_v28 }
 0x29c   :  { %2163 = vmatpush.bf16.xpose.msrb.mxu3 %v4632_v11  ;;  %2223 = vmatpush.bf16.xpose.msra.mxu0 %v4641_v15  ;;  %v4645_v15 = vld [vmem:[#allocation7 + $0x390] sm:$0xff] }
 0x29d   :  { %1718 = vmatpush.bf16.xpose.msrb.mxu2 %v4588_v9 }
 0x2a1   :  { %2044 = vmatpush.bf16.xpose.msra.mxu1 %v4613_v30  ;;  %v4752_v30 = vld [vmem:[%s5317_s8] ss:$0 sm:$0xff] }
 0x2a4   :  { %2164 = vmatpush.bf16.xpose.msrb.mxu3 %v4631_v16  ;;  %2224 = vmatpush.bf16.xpose.msra.mxu0 %v4640_v17  ;;  %v4644_v17 = vld [vmem:[#allocation7 + $0x388] sm:$0xff] }
 0x2a5   :  { %1719 = vmatpush.bf16.xpose.msrb.mxu2 %v4587_v12 }
 0x2a9   :  { %2045 = vmatpush.bf16.xpose.msra.mxu1 %v4612_v33  ;;  %v4658_v33 = vld [vmem:[#allocation7 + $0x3f8] sm:$0xff] }
 0x2ac   :  { %2165 = vmatpush.bf16.xpose.msrb.mxu3 %v4630_v19  ;;  %2225 = vmatpush.bf16.xpose.msra.mxu0 %v4639_v20  ;;  %v4643_v19 = vld [vmem:[#allocation7 + $0x380] sm:$0xff]  ;;  %v4624_v20 = vld [vmem:[#allocation7 + $0x2e8] sm:$0xff] }
 0x2ad   :  { %2100 = vmatpush.bf16.xpose.msra.mxu2 %v4626_v14 }
 0x2b1   :  { %2046 = vmatpush.bf16.xpose.msra.mxu1 %v4611_v1  ;;  %v4657_v1 = vld [vmem:[#allocation7 + $0x3f0] sm:$0xff] }
 0x2b4   :  { %2166 = vmatpush.bf16.xpose.msrb.mxu3 %v4629_v51  ;;  %2226 = vmatpush.bf16.xpose.msra.mxu0 %v4638_v22  ;;  %v4622_v51 = vld [vmem:[#allocation7 + $0x2d8] sm:$0xff]  ;;  %v4621_v22 = vld [vmem:[#allocation7 + $0x2d0] sm:$0xff] }
 0x2b5   :  { %2101 = vmatpush.bf16.xpose.msra.mxu2 %v4625_v18  ;;  %v4664_v18 = vld [vmem:[#allocation8 + $0x228] sm:$0xff] }
 0x2bc   :  { %2167 = vmatpush.bf16.xpose.msrb.mxu3 %v4628_v25  ;;  %2227 = vmatpush.bf16.xpose.msra.mxu0 %v4637_v26  ;;  %v4620_v25 = vld [vmem:[#allocation7 + $0x2c8] sm:$0xff] }
 0x2bd   :  { %2102 = vmatpush.bf16.xpose.msra.mxu2 %v4624_v20  ;;  %v4663_v20 = vld [vmem:[#allocation8 + $0x220] sm:$0xff] }
 0x2c4   :  { %2168 = vmatpush.bf16.xpose.msrb.mxu3 %v4627_v62  ;;  %2228 = vmatpush.bf16.xpose.msra.mxu0 %v4636_v29  ;;  %v4619_v29 = vld [vmem:[#allocation7 + $0x2c0] sm:$0xff] }
 0x2c5   :  { %2103 = vmatpush.bf16.xpose.msra.mxu2 %v4623_v21  ;;  %v4681_v21 = vld [vmem:[#allocation8 + $0x2b0] sm:$0xff] }
 0x2c7   :  { %v1127_v32 = vpop.f32.mrf.mxu2 }
 0x2cb   :  { %2169 = vmatmul.bf16.vlgmr.msrb.gmra.mxu3 %v5217_v6 }
 0x2cc   :  { %2229 = vmatpush.bf16.xpose.msra.mxu0 %v4635_v31 }
 0x2cd   :  { %2104 = vmatpush.bf16.xpose.msra.mxu2 %v4622_v51  ;;  %v4662_v51 = vld [vmem:[#allocation8 + $0x218] sm:$0xff] }
 0x2ce   :  { %v1249_v35 = vpop.f32.mrf.mxu3 }
 0x2cf   :  { %v1129_v37 = vpop.f32.mrf.mxu2 }
 0x2d0   :  { %v1310_v13 = vpop.f32.mrf.mxu0 }
 0x2d3   :  { %2230 = vmatmul.bf16.vlgmr.msra.gmra.mxu0 %v5217_v6 }
 0x2d5   :  { %2105 = vmatpush.bf16.xpose.msra.mxu2 %v4621_v22  ;;  %v4680_v22 = vld [vmem:[#allocation8 + $0x2a8] sm:$0xff] }
 0x2d6   :  { %v1251_v38 = vpop.f32.mrf.mxu3 }
 0x2d8   :  { %v1188_v39 = vpop.f32.mrf.mxu2  ;;  %v1312_v40 = vpop.f32.mrf.mxu0 }
 0x2d9   :  { %v1371_v41 = vpop.f32.mrf.mxu1  ;;  %v1558_v43 = vadd.f32 %v1188_v39, %v1127_v32  ;;  %v4656_v39 = vld [vmem:[#allocation7 + $0x3e8] sm:$0xff] }
 0x2db   :  { %v1559_v44 = vadd.f32 %v1558_v43, %v1249_v35  ;;  %v4653_v43 = vld [vmem:[#allocation7 + $0x3d0] sm:$0xff] }
 0x2dd   :  { %v1560_v48 = vadd.f32 %v1559_v44, %v1310_v13  ;;  %2106 = vmatpush.bf16.xpose.msra.mxu2 %v4620_v25  ;;  %v4652_v44 = vld [vmem:[#allocation7 + $0x3c8] sm:$0xff]  ;;  %v4679_v25 = vld [vmem:[#allocation8 + $0x2a0] sm:$0xff] }
 0x2df   :  { %v1561_v50 = vadd.f32 %v1560_v48, %v1371_v41  ;;  %v4655_v41 = vld [vmem:[#allocation7 + $0x3e0] sm:$0xff] }
 0x2e0   :  { %v1190_v45 = vpop.f32.mrf.mxu2  ;;  %v1554_v46 = vpop.f32.mrf.mxu0 }
 0x2e1   :  { %v1373_v47 = vpop.f32.mrf.mxu1  ;;  %v4651_v45 = vld [vmem:[#allocation7 + $0x3c0] sm:$0xff] }
 0x2e5   :  { %2107 = vmatpush.bf16.xpose.msra.mxu2 %v4619_v29  ;;  %v4677_v29 = vld [vmem:[#allocation8 + $0x290] sm:$0xff] }
 0x2e6   :  { %v1493_v49 = vpop.f32.mrf.mxu3 }
 0x2e8   :  { %v1432_v52 = vpop.f32.mrf.mxu2  ;;  %v1556_v53 = vpop.f32.mrf.mxu0 }
 0x2e9   :  { %v1562_v54 = vadd.f32 %v1561_v50, %v1432_v52 }
 0x2eb   :  { %v1563_v55 = vadd.f32 %v1562_v54, %v1493_v49 }
 0x2ed   :  { %v1564_v34 = vadd.f32 %v1563_v55, %v1554_v46 }
 0x2ee   :  { %v1495_v56 = vpop.f32.mrf.mxu3 }
 0x2ef   :  { %v1565_v36 = vpack.c.bf16 %v1564_v34, %v1564_v34 }
 0x2f0   :  { %v1434_v57 = vpop.f32.mrf.mxu2 }
 0x2f1   :  { %1642 = vmatmul.bf16.vlgmr.msrb.gmra.mxu1 %v1565_v36 }
 0x2f2   :  { %2283 = vmatpush.bf16.xpose.msrb.mxu1 %v4650_v24 }
 0x2fa   :  { %2284 = vmatpush.bf16.xpose.msrb.mxu1 %v4649_v59 }
 0x301   :  { %2047 = vmatmul.bf16.vlgmr.msra.gmra.mxu1 %v5217_v6 }
 0x302   :  { %2285 = vmatpush.bf16.xpose.msrb.mxu1 %v4648_v61  ;;  %v4666_v61 = vld [vmem:[#allocation8 + $0x238] sm:$0xff] }
 0x303   :  { %2614 = vmatpush.bf16.msra.mxu3 %v4666_v61  ;;  %v4710_v61 = vld [vmem:[#allocation8 + $0x398] sm:$0xff] }
 0x30a   :  { %2286 = vmatpush.bf16.xpose.msrb.mxu1 %v4647_v0 }
 0x30e   :  { %v1926_v4 = vpop.f32.mrf.mxu3 }
 0x30f   :  { %v5227_v7 = vadd.f32 %v1926_v4, %v5224_v3 }
 0x310   :  { %v1987_v8 = vpop.f32.mrf.mxu0 }
 0x311   :  { %v5230_v10 = vadd.f32 %v1987_v8, %v5224_v3  ;;  %2357 = vmax.xlane.f32.xlu1 %v5227_v7 }
 0x312   :  { %2287 = vmatpush.bf16.xpose.msrb.mxu1 %v4646_v5 }
 0x313   :  { %2359 = vmax.xlane.f32.xlu2 %v5230_v10 }
 0x316   :  { %v1928_v11 = vpop.f32.mrf.mxu3 }
 0x318   :  { %v1989_v16 = vpop.f32.mrf.mxu0 }
 0x31a   :  { %2288 = vmatpush.bf16.xpose.msrb.mxu1 %v4645_v15 }
 0x322   :  { %2289 = vmatpush.bf16.xpose.msrb.mxu1 %v4644_v17  ;;  %v4665_v17 = vld [vmem:[#allocation8 + $0x230] sm:$0xff] }
 0x323   :  { %2615 = vmatpush.bf16.msra.mxu3 %v4665_v17  ;;  %v4699_v17 = vld [vmem:[#allocation8 + $0x340] sm:$0xff] }
 0x327   :  { %2616 = vmatpush.bf16.msra.mxu3 %v4664_v18 }
 0x32a   :  { %2290 = vmatpush.bf16.xpose.msrb.mxu1 %v4643_v19  ;;  %v4682_v19 = vld [vmem:[#allocation8 + $0x2b8] sm:$0xff] }
 0x32b   :  { %2617 = vmatpush.bf16.msra.mxu3 %v4663_v20  ;;  %v4690_v20 = vld [vmem:[#allocation8 + $0x2f8] sm:$0xff] }
 0x32f   :  { %2618 = vmatpush.bf16.msra.mxu3 %v4662_v51  ;;  %v4689_v51 = vld [vmem:[#allocation8 + $0x2f0] sm:$0xff] }
 0x331   :  { %2291 = vmatmul.bf16.vlgmr.msrb.gmra.mxu1 %v5217_v6 }
 0x332   :  { %2736 = vmatpush.bf16.msra.mxu1 %v4682_v19 }
 0x336   :  { %2737 = vmatpush.bf16.msra.mxu1 %v4681_v21  ;;  %v4698_v21 = vld [vmem:[#allocation8 + $0x338] sm:$0xff] }
 0x33a   :  { %2738 = vmatpush.bf16.msra.mxu1 %v4680_v22  ;;  %v4697_v22 = vld [vmem:[#allocation8 + $0x330] sm:$0xff] }
 0x33e   :  { %2739 = vmatpush.bf16.msra.mxu1 %v4679_v25  ;;  %v4688_v25 = vld [vmem:[#allocation8 + $0x2e8] sm:$0xff] }
 0x34e   :  { %v2170_v23 = vpop.f32.mrf.mxu3 }
 0x350   :  { %v2231_v26 = vpop.f32.mrf.mxu0 }
 0x351   :  { %v2232_v48 = vadd.f32 %v2231_v26, %v5224_v3  ;;  %v4660_v26 = vld [vmem:[#allocation8 + $0x208] sm:$0xff] }
 0x356   :  { %v2172_v28 = vpop.f32.mrf.mxu3 }
 0x357   :  { %v4678_v28 = vld [vmem:[#allocation8 + $0x298] sm:$0xff] }
 0x358   :  { %v2233_v62 = vpop.f32.mrf.mxu0  ;;  %2740 = vmatpush.bf16.msra.mxu1 %v4678_v28  ;;  %v4696_v28 = vld [vmem:[#allocation8 + $0x328] sm:$0xff] }
 0x359   :  { %v4659_v62 = vld [vmem:[#allocation8 + $0x200] sm:$0xff] }
 0x35c   :  { %2741 = vmatpush.bf16.msra.mxu1 %v4677_v29 }
 0x36e   :  { %v1643_v31 = vpop.f32.mrf.mxu1 }
 0x36f   :  { %v1644_v32 = vadd.f32 %v4752_v30, %v1643_v31  ;;  %v4676_v30 = vld [vmem:[#allocation8 + $0x288] sm:$0xff] }
 0x370   :  { %2742 = vmatpush.bf16.msra.mxu1 %v4676_v30 }
 0x371   :  { %v1647_v35 = vpack.c.bf16 %v1644_v32, %v1644_v32  ;;  %v4675_v32 = vld [vmem:[#allocation8 + $0x280] sm:$0xff] }
 0x373   :  { %1720 = vmatmul.bf16.vlgmr.msrb.gmra.mxu2 %v1647_v35 }
 0x374   :  { %2344 = vmatpush.bf16.xpose.msrb.mxu2 %v4658_v33  ;;  %v4674_v33 = vld [vmem:[#allocation8 + $0x278] sm:$0xff]  ;;  %2743 = vmatpush.bf16.msra.mxu1 %v4675_v32 }
 0x375   :  { %2675 = vmatpush.bf16.msrb.mxu0 %v4674_v33  ;;  %v4686_v32 = vld [vmem:[#allocation8 + $0x2d8] sm:$0xff] }
 0x376   :  { %v1645_v37 = vpop.f32.mrf.mxu1 }
 0x37c   :  { %2345 = vmatpush.bf16.xpose.msrb.mxu2 %v4657_v1  ;;  %v4673_v1 = vld [vmem:[#allocation8 + $0x270] sm:$0xff] }
 0x37d   :  { %2676 = vmatpush.bf16.msrb.mxu0 %v4673_v1 }
 0x37e   :  { %v2048_v13 = vpop.f32.mrf.mxu1 }
 0x37f   :  { %v2049_v38 = vadd.f32 %v2048_v13, %v5224_v3  ;;  %v4714_v13 = vld [vmem:[#allocation8 + $0x3b8] sm:$0xff] }
 0x381   :  { %2361 = vmax.xlane.f32.xlu1 %v2049_v38 }
 0x383   :  { %2108 = vmatmul.bf16.vlgmr.msra.gmra.mxu2 %v5217_v6 }
 0x384   :  { %2346 = vmatpush.bf16.xpose.msrb.mxu2 %v4656_v39  ;;  %v2358_v53 = vpop.xlane.xlu1 %2357 }
 0x385   :  { %v2373_v55 = vsub.f32 %v5227_v7, %v2358_v53  ;;  %v4669_v53 = vld [vmem:[#allocation8 + $0x250] sm:$0xff] }
 0x386   :  { %v2050_v40 = vpop.f32.mrf.mxu1  ;;  %v2360_v60 = vpop.xlane.xlu2 %2359 }
 0x387   :  { %v2381_v34 = vmul.f32 1.442695, %v2373_v55  ;;  %v2374_v63 = vsub.f32 %v5230_v10, %v2360_v60  ;;  %v4711_v55 = vld [vmem:[#allocation8 + $0x3a0] sm:$0xff]  ;;  %v4704_v60 = vld [vmem:[#allocation8 + $0x368] sm:$0xff] }
 0x389   :  { %4786 = vpow2.f32 %v2381_v34  ;;  %v2383_v2 = vmul.f32 1.442695, %v2374_v63 }
 0x38c   :  { %2347 = vmatpush.bf16.xpose.msrb.mxu2 %v4655_v41 }
 0x38f   :  { %v5254_v58 = vpop.eup %4786 }
 0x394   :  { %2348 = vmatpush.bf16.xpose.msrb.mxu2 %v4654_v42 }
 0x39c   :  { %2349 = vmatpush.bf16.xpose.msrb.mxu2 %v4653_v43  ;;  %v4671_v43 = vld [vmem:[#allocation8 + $0x260] sm:$0xff] }
 0x3a4   :  { %2350 = vmatpush.bf16.xpose.msrb.mxu2 %v4652_v44  ;;  %v4713_v44 = vld [vmem:[#allocation8 + $0x3b0] sm:$0xff] }
 0x3ac   :  { %2351 = vmatpush.bf16.xpose.msrb.mxu2 %v4651_v45 }
 0x3ae   :  { %v2292_v46 = vpop.f32.mrf.mxu1 }
 0x3af   :  { %v2293_v47 = vadd.f32 %v2292_v46, %v5224_v3 }
 0x3b1   :  { %2369 = vmax.xlane.f32.xlu2 %v2293_v47 }
 0x3b3   :  { %2352 = vmatmul.bf16.vlgmr.msrb.gmra.mxu2 %v5217_v6  ;;  %v5251_v6 = vadd.f32 %v2170_v23, %v5224_v3  ;;  %v4661_v23 = vld [vmem:[#allocation8 + $0x210] sm:$0xff] }
 0x3b4   :  { %2619 = vmatpush.bf16.msra.mxu3 %v4661_v23  ;;  %2980 = vmatpush.bf16.msra.mxu2 %v4714_v13 }
 0x3b6   :  { %v2294_v27 = vpop.f32.mrf.mxu1 }
 0x3b7   :  { %v4670_v27 = vld [vmem:[#allocation8 + $0x258] sm:$0xff] }
 0x3b8   :  { %2620 = vmatpush.bf16.msra.mxu3 %v4660_v26  ;;  %2981 = vmatpush.bf16.msra.mxu2 %v4713_v44  ;;  %v4683_v44 = vld [vmem:[#allocation8 + $0x2c0] sm:$0xff] }
 0x3b9   :  { %2367 = vmax.xlane.f32.xlu2 %v2232_v48 }
 0x3bc   :  { %2621 = vmatpush.bf16.msra.mxu3 %v4659_v62 }
 0x3c0   :  { %2797 = vmatpush.bf16.msrb.mxu3 %v4690_v20 }
 0x3c4   :  { %2798 = vmatpush.bf16.msrb.mxu3 %v4689_v51  ;;  %v4730_v51 = vld [vmem:[#allocation14 + $0x38] sm:$0xff] }
 0x3c8   :  { %2799 = vmatpush.bf16.msrb.mxu3 %v4688_v25  ;;  %v4727_v25 = vld [vmem:[#allocation14 + $0x20] sm:$0xff] }
 0x3f4   :  { %v2362_v24 = vpop.xlane.xlu1 %2361 }
 0x3f5   :  { %v2375_v36 = vsub.f32 %v2049_v38, %v2362_v24  ;;  %v4672_v38 = vld [vmem:[#allocation8 + $0x268] sm:$0xff] }
 0x3f6   :  { %v5243_v49 = vpop.f32.mrf.mxu2  ;;  %2677 = vmatpush.bf16.msrb.mxu0 %v4672_v38 }
 0x3f7   :  { %v2385_v57 = vmul.f32 1.442695, %v2375_v36 }
 0x3f9   :  { %4788 = vpow2.f32 %v2385_v57  ;;  %v4668_v57 = vld [vmem:[#allocation8 + $0x248] sm:$0xff] }
 0x3fa   :  { %4790 = vpow2.f32 %v2383_v2  ;;  %2678 = vmatpush.bf16.msrb.mxu0 %v4671_v43  ;;  %v4709_v2 = vld [vmem:[#allocation8 + $0x390] sm:$0xff]  ;;  %v4694_v43 = vld [vmem:[#allocation8 + $0x318] sm:$0xff] }
 0x3fe   :  { %v1723_v50 = vpop.f32.mrf.mxu2  ;;  %2679 = vmatpush.bf16.msrb.mxu0 %v4670_v27  ;;  %v4722_v27 = vld [vmem:[#allocation8 + $0x3f8] sm:$0xff] }
 0x3ff   :  { %v5257_v59 = vpop.eup %4788  ;;  %v4712_v50 = vld [vmem:[#allocation8 + $0x3a8] sm:$0xff] }
 0x400   :  { %v5265_v15 = vpop.eup %4790  ;;  %2982 = vmatpush.bf16.msra.mxu2 %v4712_v50  ;;  %v4720_v50 = vld [vmem:[#allocation8 + $0x3e8] sm:$0xff] }
 0x402   :  { %2680 = vmatpush.bf16.msrb.mxu0 %v4669_v53 }
 0x404   :  { %2983 = vmatpush.bf16.msra.mxu2 %v4711_v55 }
 0x406   :  { %v2109_v52 = vpop.f32.mrf.mxu2  ;;  %2681 = vmatpush.bf16.msrb.mxu0 %v4668_v57 }
 0x407   :  { %v5246_v54 = vadd.f32 %v2109_v52, %v5224_v3 }
 0x408   :  { %2984 = vmatpush.bf16.msra.mxu2 %v4710_v61 }
 0x409   :  { %2363 = vmax.xlane.f32.xlu0 %v5246_v54 }
 0x40c   :  { %2985 = vmatpush.bf16.msra.mxu2 %v4709_v2 }
 0x40e   :  { %v2111_v56 = vpop.f32.mrf.mxu2 }
 0x411   :  { %2365 = vmax.xlane.f32.xlu0 %v5251_v6 }
 0x419   :  { %2397 = vadd.xlane.f32.xlu0 %v5254_v58 }
 0x421   :  { %2401 = vadd.xlane.f32.xlu0 %v5257_v59 }
 0x424   :  { %v2370_v0 = vpop.xlane.xlu2 %2369 }
 0x425   :  { %v2379_v7 = vsub.f32 %v2293_v47, %v2370_v0  ;;  %v4703_v0 = vld [vmem:[#allocation8 + $0x360] sm:$0xff] }
 0x427   :  { %v2393_v8 = vmul.f32 1.442695, %v2379_v7 }
 0x429   :  { %4792 = vpow2.f32 %v2393_v8  ;;  %v4702_v8 = vld [vmem:[#allocation8 + $0x358] sm:$0xff] }
 0x42c   :  { %v2368_v11 = vpop.xlane.xlu2 %2367 }
 0x42d   :  { %v2378_v10 = vsub.f32 %v2232_v48, %v2368_v11  ;;  %v4706_v48 = vld [vmem:[#allocation8 + $0x378] sm:$0xff]  ;;  %v4701_v11 = vld [vmem:[#allocation8 + $0x350] sm:$0xff] }
 0x42e   :  { %2919 = vmatpush.bf16.msrb.mxu1 %v4706_v48 }
 0x42f   :  { %v2391_v12 = vmul.f32 1.442695, %v2378_v10  ;;  %v5268_v14 = vpop.eup %4792  ;;  %v4707_v10 = vld [vmem:[#allocation8 + $0x380] sm:$0xff] }
 0x431   :  { %4794 = vpow2.f32 %v2391_v12  ;;  %v4700_v12 = vld [vmem:[#allocation8 + $0x348] sm:$0xff] }
 0x436   :  { %v2353_v4 = vpop.f32.mrf.mxu2 }
 0x437   :  { %v5262_v5 = vadd.f32 %v2353_v4, %v5224_v3  ;;  %v5271_v16 = vpop.eup %4794 }
 0x439   :  { %2371 = vmax.xlane.f32.xlu1 %v5262_v5 }
 0x43e   :  { %v2355_v9 = vpop.f32.mrf.mxu2 }
 0x43f   :  { %v4708_v9 = vld [vmem:[#allocation8 + $0x388] sm:$0xff] }
 0x440   :  { %2986 = vmatpush.bf16.msra.mxu2 %v4708_v9 }
 0x441   :  { %2399 = vadd.xlane.f32.xlu1 %v5265_v15 }
 0x444   :  { %2987 = vmatpush.bf16.msra.mxu2 %v4707_v10 }
 0x449   :  { %2409 = vadd.xlane.f32.xlu1 %v5268_v14 }
 0x451   :  { %2407 = vadd.xlane.f32.xlu1 %v5271_v16 }
 0x47c   :  { %v2364_v31 = vpop.xlane.xlu0 %2363 }
 0x47d   :  { %v2376_v35 = vsub.f32 %v5246_v54, %v2364_v31  ;;  %v4705_v54 = vld [vmem:[#allocation8 + $0x370] sm:$0xff] }
 0x47e   :  { %2920 = vmatpush.bf16.msrb.mxu1 %v4705_v54 }
 0x47f   :  { %v2387_v37 = vmul.f32 1.442695, %v2376_v35 }
 0x481   :  { %4796 = vpow2.f32 %v2387_v37 }
 0x482   :  { %4798 = vtanh.f32 %v5243_v49  ;;  %2921 = vmatpush.bf16.msrb.mxu1 %v4704_v60 }
 0x484   :  { %v2366_v39 = vpop.xlane.xlu0 %2365 }
 0x485   :  { %v2377_v40 = vsub.f32 %v5251_v6, %v2366_v39  ;;  %v4830_v6 = vld [vmem:[#allocation11] sm:$0xff] }
 0x486   :  { %2922 = vmatpush.bf16.msrb.mxu1 %v4703_v0 }
 0x487   :  { %v5276_v41 = vpop.eup %4796  ;;  %v2389_v42 = vmul.f32 1.442695, %v2377_v40  ;;  %v4695_v40 = vld [vmem:[#allocation8 + $0x320] sm:$0xff] }
 0x488   :  { %2403 = vadd.xlane.f32.xlu2 %v5276_v41  ;;  %v4799_v46 = vpop.eup %4798 }
 0x489   :  { %4800 = vpow2.f32 %v2389_v42  ;;  %v1726_v49 = vmul.f32 10.0, %v4799_v46  ;;  %v4684_v42 = vld [vmem:[#allocation8 + $0x2c8] sm:$0xff]  ;;  %v4691_v46 = vld [vmem:[#allocation8 + $0x300] sm:$0xff] }
 0x48a   :  { %2923 = vmatpush.bf16.msrb.mxu1 %v4702_v8 }
 0x48b   :  { %v5284_v24 = vadd.f32 %v4830_v6, %v1726_v49  ;;  %v4717_v6 = vld [vmem:[#allocation8 + $0x3d0] sm:$0xff] }
 0x48c   :  { %v2398_v45 = vpop.xlane.xlu0 %2397 }
 0x48d   :  { %4802 = vrcp.f32 %v2398_v45  ;;  %v4693_v45 = vld [vmem:[#allocation8 + $0x310] sm:$0xff] }
 0x48e   :  { %2924 = vmatpush.bf16.msrb.mxu1 %v4701_v11 }
 0x48f   :  { %v5280_v47 = vpop.eup %4800 }
 0x490   :  { %2405 = vadd.xlane.f32.xlu2 %v5280_v47 }
 0x492   :  { %2925 = vmatpush.bf16.msrb.mxu1 %v4700_v12 }
 0x493   :  { %v4803_v52 = vpop.eup %4802 }
 0x494   :  { %v2421_v34 = vmul.f32 %v4803_v52, %v5254_v58  ;;  %v2402_v56 = vpop.xlane.xlu0 %2401  ;;  %v4667_v58 = vld [vmem:[#allocation8 + $0x240] sm:$0xff] }
 0x495   :  { %4804 = vrcp.f32 %v2402_v56  ;;  %2682 = vmatpush.bf16.msrb.mxu0 %v4667_v58  ;;  %v4719_v52 = vld [vmem:[#allocation8 + $0x3e0] sm:$0xff]  ;;  %v4716_v58 = vld [vmem:[#allocation8 + $0x3c8] sm:$0xff] }
 0x496   :  { %v2429_v36 = vpack.c.bf16 %v2421_v34, %v2421_v34  ;;  %2926 = vmatpush.bf16.msrb.mxu1 %v4699_v17  ;;  %v4718_v34 = vld [vmem:[#allocation8 + $0x3d8] sm:$0xff] }
 0x498   :  { %1728 = vmax.xlane.f32.xlu2 %v5284_v24  ;;  %2622 = vmatmul.bf16.vlgmr.msra.gmra.mxu3 %v2429_v36 }
 0x499   :  { %2858 = vmatpush.bf16.msra.mxu0 %v4698_v21 }
 0x49b   :  { %v4805_v63 = vpop.eup %4804 }
 0x49c   :  { %v2423_v4 = vmul.f32 %v4805_v63, %v5257_v59 }
 0x49d   :  { %2859 = vmatpush.bf16.msra.mxu0 %v4697_v22  ;;  %v4729_v22 = vld [vmem:[#allocation14 + $0x30] sm:$0xff] }
 0x49e   :  { %v2431_v7 = vpack.c.bf16 %v2423_v4, %v2423_v4 }
 0x4a0   :  { %2744 = vmatmul.bf16.vlgmr.msra.gmra.mxu1 %v2431_v7 }
 0x4a1   :  { %2860 = vmatpush.bf16.msra.mxu0 %v4696_v28  ;;  %v4726_v28 = vld [vmem:[#allocation14 + $0x18] sm:$0xff] }
 0x4a5   :  { %2861 = vmatpush.bf16.msra.mxu0 %v4695_v40  ;;  %v4737_v40 = vld [vmem:[#allocation10 + $0x70] sm:$0xff] }
 0x4a9   :  { %2862 = vmatpush.bf16.msra.mxu0 %v4694_v43  ;;  %v4735_v43 = vld [vmem:[#allocation10 + $0x60] sm:$0xff] }
 0x4ac   :  { %v2372_v18 = vpop.xlane.xlu1 %2371 }
 0x4ad   :  { %v2380_v19 = vsub.f32 %v5262_v5, %v2372_v18  ;;  %v4687_v5 = vld [vmem:[#allocation8 + $0x2e0] sm:$0xff]  ;;  %2863 = vmatpush.bf16.msra.mxu0 %v4693_v45 }
 0x4ae   :  { %2800 = vmatpush.bf16.msrb.mxu3 %v4687_v5 }
 0x4af   :  { %v2395_v59 = vmul.f32 1.442695, %v2380_v19 }
 0x4b1   :  { %4806 = vpow2.f32 %v2395_v59 }
 0x4b2   :  { %2801 = vmatpush.bf16.msrb.mxu3 %v4686_v32 }
 0x4b4   :  { %v2400_v23 = vpop.xlane.xlu1 %2399 }
 0x4b5   :  { %4808 = vrcp.f32 %v2400_v23  ;;  %v4728_v23 = vld [vmem:[#allocation14 + $0x28] sm:$0xff] }
 0x4b7   :  { %v5289_v26 = vpop.eup %4806 }
 0x4b8   :  { %2411 = vadd.xlane.f32.xlu0 %v5289_v26 }
 0x4bb   :  { %v4809_v62 = vpop.eup %4808 }
 0x4bc   :  { %v2422_v29 = vmul.f32 %v4809_v62, %v5265_v15  ;;  %v2410_v30 = vpop.xlane.xlu1 %2409  ;;  %v4685_v15 = vld [vmem:[#allocation8 + $0x2d0] sm:$0xff] }
 0x4bd   :  { %4810 = vrcp.f32 %v2410_v30  ;;  %2802 = vmatpush.bf16.msrb.mxu3 %v4685_v15  ;;  %v4738_v15 = vld [vmem:[#allocation10 + $0x78] sm:$0xff] }
 0x4be   :  { %v2430_v31 = vpack.c.bf16 %v2422_v29, %v2422_v29  ;;  %v4724_v29 = vld [vmem:[#allocation14 + $0x8] sm:$0xff]  ;;  %3209 = vmatpush.bf16.xpose.msra.mxu1 %v4738_v15 }
 0x4c0   :  { %2683 = vmatmul.bf16.vlgmr.msrb.gmra.mxu0 %v2430_v31 }
 0x4c1   :  { %2803 = vmatpush.bf16.msrb.mxu3 %v4684_v42  ;;  %v4736_v42 = vld [vmem:[#allocation10 + $0x68] sm:$0xff] }
 0x4c3   :  { %v4811_v33 = vpop.eup %4810 }
 0x4c4   :  { %v2427_v35 = vmul.f32 %v4811_v33, %v5268_v14  ;;  %v2408_v37 = vpop.xlane.xlu1 %2407  ;;  %v4692_v14 = vld [vmem:[#allocation8 + $0x308] sm:$0xff] }
 0x4c5   :  { %4812 = vrcp.f32 %v2408_v37  ;;  %2804 = vmatpush.bf16.msrb.mxu3 %v4683_v44  ;;  %2864 = vmatpush.bf16.msra.mxu0 %v4692_v14 }
 0x4c6   :  { %v2435_v1 = vpack.c.bf16 %v2427_v35, %v2427_v35  ;;  %3210 = vmatpush.bf16.xpose.msra.mxu1 %v4737_v40 }
 0x4c8   :  { %2988 = vmatmul.bf16.vlgmr.msra.gmra.mxu2 %v2435_v1 }
 0x4c9   :  { %2865 = vmatpush.bf16.msra.mxu0 %v4691_v46  ;;  %3041 = vmatpush.bf16.msra.mxu3 %v4722_v27  ;;  %v4734_v46 = vld [vmem:[#allocation10 + $0x58] sm:$0xff] }
 0x4cb   :  { %v4813_v13 = vpop.eup %4812 }
 0x4cc   :  { %v2426_v38 = vmul.f32 %v4813_v13, %v5271_v16  ;;  %v4721_v16 = vld [vmem:[#allocation8 + $0x3f0] sm:$0xff] }
 0x4cd   :  { %3042 = vmatpush.bf16.msra.mxu3 %v4721_v16  ;;  %3130 = vmatpush.bf16.msrb.mxu0 %v4730_v51  ;;  %v4733_v16 = vld [vmem:[#allocation10 + $0x50] sm:$0xff] }
 0x4ce   :  { %v2434_v39 = vpack.c.bf16 %v2426_v38, %v2426_v38  ;;  %3211 = vmatpush.bf16.xpose.msra.mxu1 %v4736_v42 }
 0x4d0   :  { %2927 = vmatmul.bf16.vlgmr.msrb.gmra.mxu1 %v2434_v39  ;;  %v4723_v39 = vld [vmem:[#allocation14] sm:$0xff] }
 0x4d1   :  { %3043 = vmatpush.bf16.msra.mxu3 %v4720_v50  ;;  %3131 = vmatpush.bf16.msrb.mxu0 %v4729_v22  ;;  %v4731_v50 = vld [vmem:[#allocation10 + $0x40] sm:$0xff] }
 0x4d5   :  { %3044 = vmatpush.bf16.msra.mxu3 %v4719_v52  ;;  %3132 = vmatpush.bf16.msrb.mxu0 %v4728_v23 }
 0x4d6   :  { %3212 = vmatpush.bf16.xpose.msra.mxu1 %v4735_v43 }
 0x4d9   :  { %3045 = vmatpush.bf16.msra.mxu3 %v4718_v34  ;;  %3133 = vmatpush.bf16.msrb.mxu0 %v4727_v25 }
 0x4dd   :  { %3046 = vmatpush.bf16.msra.mxu3 %v4717_v6  ;;  %3134 = vmatpush.bf16.msrb.mxu0 %v4726_v28 }
 0x4de   :  { %3213 = vmatpush.bf16.xpose.msra.mxu1 %v4734_v46 }
 0x4e1   :  { %3047 = vmatpush.bf16.msra.mxu3 %v4716_v58 }
 0x4e6   :  { %3214 = vmatpush.bf16.xpose.msra.mxu1 %v4733_v16 }
 0x4fb   :  { %v2404_v48 = vpop.xlane.xlu2 %2403 }
 0x4fc   :  { %4814 = vrcp.f32 %v2404_v48  ;;  %v4732_v48 = vld [vmem:[#allocation10 + $0x48] sm:$0xff] }
 0x4fd   :  { %3215 = vmatpush.bf16.xpose.msra.mxu1 %v4732_v48 }
 0x502   :  { %v4815_v49 = vpop.eup %4814 }
 0x503   :  { %v2424_v53 = vmul.f32 %v4815_v49, %v5276_v41  ;;  %v2406_v54 = vpop.xlane.xlu2 %2405  ;;  %v4715_v41 = vld [vmem:[#allocation8 + $0x3c0] sm:$0xff] }
 0x504   :  { %4816 = vrcp.f32 %v2406_v54  ;;  %3048 = vmatpush.bf16.msra.mxu3 %v4715_v41  ;;  %v4753_v49 = vld [vmem:[%s5317_s8] ss:$0 sm:$0xff]  ;;  %s5071_s8 = smov [#allocation16]  }
 0x505   :  { %v2432_v55 = vpack.c.bf16 %v2424_v53, %v2424_v53  ;;  %3216 = vmatpush.bf16.xpose.msra.mxu1 %v4731_v50  ;;  %s3240_s28 = sshll.u32 %s5071_s8, 4  ;;  %s3241_s28 = int_to_ptr.vmem [resolvable:$true] %s3240_s28 }
 0x507   :  { %2805 = vmatmul.bf16.vlgmr.msrb.gmra.mxu3 %v2432_v55 }
 0x50a   :  { %v4817_v56 = vpop.eup %4816 }
 0x50b   :  { %v2425_v36 = vmul.f32 %v4817_v56, %v5280_v47  ;;  %v1729_v57 = vpop.xlane.xlu2 %1728 }
 0x50c   :  { %v1730_v60 = vsub.f32 %v5284_v24, %v1729_v57 }
 0x50d   :  { %v2433_v61 = vpack.c.bf16 %v2425_v36, %v2425_v36 }
 0x50e   :  { %v1731_v63 = vmul.f32 1.442695, %v1730_v60 }
 0x50f   :  { %2866 = vmatmul.bf16.vlgmr.msra.gmra.mxu0 %v2433_v61 }
 0x510   :  { %4818 = vpow2.f32 %v1731_v63 }
 0x516   :  { %v4819_v0 = vpop.eup %4818 }
 0x517   :  { %1733 = vadd.xlane.f32.xlu1 %v4819_v0 }
 0x51b   :  { %v2623_v2 = vpop.f32.mrf.mxu3 }
 0x51d   :  { %v2745_v4 = vpop.f32.mrf.mxu1 }
 0x523   :  { %v2625_v7 = vpop.f32.mrf.mxu3 }
 0x525   :  { %v2747_v8 = vpop.f32.mrf.mxu1 }
 0x52b   :  { %v2412_v9 = vpop.xlane.xlu0 %2411 }
 0x52c   :  { %4820 = vrcp.f32 %v2412_v9 }
 0x532   :  { %v4821_v47 = vpop.eup %4820 }
 0x533   :  { %v2428_v24 = vmul.f32 %v4821_v47, %v5289_v26  ;;  %v4725_v26 = vld [vmem:[#allocation14 + $0x10] sm:$0xff] }
 0x534   :  { %3135 = vmatpush.bf16.msrb.mxu0 %v4725_v26 }
 0x535   :  { %v2436_v11 = vpack.c.bf16 %v2428_v24, %v2428_v24 }
 0x537   :  { %3049 = vmatmul.bf16.vlgmr.msra.gmra.mxu3 %v2436_v11 }
 0x538   :  { %3136 = vmatpush.bf16.msrb.mxu0 %v4724_v29 }
 0x53c   :  { %3137 = vmatpush.bf16.msrb.mxu0 %v4723_v39 }
 0x53d   :  { %v2684_v10 = vpop.f32.mrf.mxu0 }
 0x53e   :  { %v3054_v12 = vadd.f32 %v2684_v10, %v2623_v2 }
 0x540   :  { %v3055_v17 = vadd.f32 %v3054_v12, %v2745_v4 }
 0x545   :  { %v2686_v18 = vpop.f32.mrf.mxu0 }
 0x54b   :  { %v2989_v19 = vpop.f32.mrf.mxu2 }
 0x54d   :  { %v2928_v59 = vpop.f32.mrf.mxu1 }
 0x553   :  { %v2991_v20 = vpop.f32.mrf.mxu2 }
 0x555   :  { %v2930_v21 = vpop.f32.mrf.mxu1 }
 0x58a   :  { %v2806_v5 = vpop.f32.mrf.mxu3  ;;  %v1734_v62 = vpop.xlane.xlu1 %1733 }
 0x58b   :  { %v3056_v30 = vadd.f32 %v3055_v17, %v2806_v5  ;;  %4822 = vrcp.f32 %v1734_v62 }
 0x58c   :  { %v2867_v31 = vpop.f32.mrf.mxu0 }
 0x58d   :  { %v3057_v32 = vadd.f32 %v3056_v30, %v2867_v31 }
 0x58f   :  { %v3058_v33 = vadd.f32 %v3057_v32, %v2928_v59 }
 0x591   :  { %v4823_v35 = vpop.eup %4822  ;;  %v3059_v37 = vadd.f32 %v3058_v33, %v2989_v19 }
 0x592   :  { %v1736_v1 = vmul.f32 %v4823_v35, %v4819_v0  ;;  %v2808_v13 = vpop.f32.mrf.mxu3 }
 0x594   :  { %1737 = vst [vmem:[#allocation16] sm:$0xff] %v1736_v1  ;;  %v2869_v38 = vpop.f32.mrf.mxu0 }
 0x5ba   :  { %v3050_v44 = vpop.f32.mrf.mxu3 }
 0x5bb   :  { %v3060_v45 = vadd.f32 %v3059_v37, %v3050_v44 }
 0x5bd   :  { %v3061_v14 = vpack.c.bf16 %v3060_v45, %v3060_v45 }
 0x5bf   :  { %3138 = vmatmul.bf16.vlgmr.msrb.gmra.mxu0 %v3061_v14 }
 0x5c2   :  { %v3052_v27 = vpop.f32.mrf.mxu3 }
 0x63c   :  { %v3139_v52 = vpop.f32.mrf.mxu0 }
 0x63d   :  { %v3140_v53 = vadd.f32 %v4753_v49, %v3139_v52 }
 0x63f   :  { %v3143_v54 = vpack.c.bf16 %v3140_v53, %v3140_v53 }
 0x641   :  { %3217 = vmatmul.bf16.vlgmr.msra.gmra.mxu1 %v3143_v54 }
 0x644   :  { %v3141_v55 = vpop.f32.mrf.mxu0 }
 0x6be   :  { %v3218_v34 = vpop.f32.mrf.mxu1 }
 0x6bf   :  { %4824 = vtanh.f32 %v3218_v34 }
 0x6c5   :  { %v4825_v56 = vpop.eup %4824 }
 0x6c6   :  { %v3223_v6 = vmul.f32 10.0, %v4825_v56  ;;  %v3220_v36 = vpop.f32.mrf.mxu1 }
 0x6c8   :  { %v3224_v57 = vadd.f32 %v3223_v6, %v5224_v3 }
 0x6ca   :  { %3225 = vmax.xlane.f32.xlu0 %v3224_v57 }
 0x73d   :  { %v3226_v60 = vpop.xlane.xlu0 %3225 }
 0x73e   :  { %v3227_v61 = vsub.f32 %v3224_v57, %v3226_v60 }
 0x740   :  { %v3228_v63 = vmul.f32 1.442695, %v3227_v61 }
 0x742   :  { %4826 = vpow2.f32 %v3228_v63 }
 0x748   :  { %v4827_v58 = vpop.eup %4826 }
 0x749   :  { %3230 = vadd.xlane.f32.xlu2 %v4827_v58 }
 0x7bc   :  { %v3231_v41 = vpop.xlane.xlu2 %3230 }
 0x7bd   :  { %4828 = vrcp.f32 %v3231_v41 }
 0x7c3   :  { %v4829_v0 = vpop.eup %4828 }
 0x7c4   :  { %v3233_v2 = vmul.f32 %v4829_v0, %v4827_v58 }
 0x7c6   :  { %3235 = vst [vmem:[#allocation16 + $0x8] sm:$0xff] %v3233_v2 }
 0x7c7   :  { %3248 = dma.vmem_to_hbm [thread:$0]  %s3241_s28, 256, %s3243_s30, [#allocation4], %s5060_s14, %s5060_s14, %s5061_s15  }
 0x7c8   :  { %5057 = dma.done.wait [#allocation4], 256  }
 0x7c9   :  { %5058 = vsyncadd [#allocation4], 4294967040 }
 0x7ca   :  { %3253 = vsyncpa [#allocation3], 1 }
 0x7cb   :  { %3254 = vsyncpa [#allocation6], 1 }
 0x7cc   :  { %3255 = vsyncpa [#allocation9], 1 }
 0x7cd   :  { %3256 = vsyncpa [#allocation12], 1 }
 0x7ce   :  { %3257 = vsyncpa [#allocation15], 1 }
 0x7cf   :  { %3258 = vsyncpa [#allocation4], 1 }

</bundles_post_ra>
